<compile_context>
chip_gen: v5e
topology: v5e:2x2
jax: 0.10.0
libtpu: 0.0.40
codegen_flags: <defaults>
</compile_context>

<pallas_src>
import functools

import jax
import jax.numpy as jnp
from jax import lax
from jax.experimental import pallas as pl
from jax.experimental.pallas import tpu as pltpu

_VMEM_LIMIT_BYTES = 48 * 1024 * 1024


def _round_up(x, m):
    return (x + m - 1) // m * m


def _largest_divisor_leq(n, cap):
    d = max(1, min(n, cap))
    while n % d != 0:
        d -= 1
    return d


# ------------- Kernel 1: fused input projection + bidirectional recurrence ----


def _bilstm_kernel(x_ref, wi_ref, wh_ref, b_ref, out_ref,
                   pre_sc, h_sc, c_sc, *,
                   Tc, B, H, n_chunks, T_real, masked, compute_dtype):
    d = pl.program_id(0)      # direction: 0 = forward, 1 = backward (reversed time)
    c = pl.program_id(1)      # time chunk, in this direction's processing order

    # Reset this direction's recurrent state before its first chunk.
    @pl.when(c == 0)
    def _():
        h_sc[d] = jnp.zeros((B, H), h_sc.dtype)
        c_sc[d] = jnp.zeros((B, H), c_sc.dtype)

    # Input projection for the whole chunk: ONE MXU matmul off the serial
    # per-step chain.  pre = x @ W_ih + (b_ih + b_hh), f32 accumulation.
    pre_sc[...] = (jnp.dot(x_ref[...], wi_ref[...],
                           preferred_element_type=jnp.float32) + b_ref[...])

    # Chunk index in absolute (padded) time coordinates.
    chunk_t = c + d * (n_chunks - 1 - 2 * c)
    H3 = 3 * H

    def step(j, carry):
        h, c_prev = carry
        # Forward walks j = 0..Tc-1 in time order; backward walks it reversed.
        r = j + d * (Tc - 1 - 2 * j)
        row = pl.multiple_of(r * B, 8)

        # Per-direction recurrent matmul + precomputed input projection.
        gates = (jnp.dot(h, wh_ref[...], preferred_element_type=jnp.float32)
                 + pre_sc[pl.ds(row, B), :])
        ga = gates.astype(compute_dtype)
        # Gate columns were permuted to (i, f, o, g) in the wrapper: one
        # sigmoid over a contiguous 3H slab, one tanh over H.
        sig = jax.nn.sigmoid(ga[:, :H3])
        g_act = jnp.tanh(ga[:, H3:])
        c_new = sig[:, H:2 * H] * c_prev + sig[:, :H] * g_act   # f32 cell state
        h_new = sig[:, 2 * H:H3] * jnp.tanh(c_new)               # f32

        if masked:
            # Zero-padded time steps (hit first by the backward direction) must
            # leave the recurrent state untouched.
            valid = (chunk_t * Tc + r) < T_real
            c_new = jnp.where(valid, c_new, c_prev)
            h_keep = jnp.where(valid, h_new, h.astype(jnp.float32))
        else:
            h_keep = h_new

        out_ref[r] = h_new.astype(out_ref.dtype)
        return h_keep.astype(h.dtype), c_new

    h_fin, c_fin = lax.fori_loop(0, Tc, step, (h_sc[d], c_sc[d]), unroll=True)
    h_sc[d] = h_fin
    c_sc[d] = c_fin


# ------------------------------ Kernel 2: Linear -------------------------------
# out = h_fwd @ W[:H] + h_bwd @ W[H:] + b    (no (T*B, 2H) concat required)


def _linear_kernel(rec_ref, wf_ref, wb_ref, b_ref, o_ref):
    o_ref[...] = (
        jnp.dot(rec_ref[0], wf_ref[...], preferred_element_type=jnp.float32)
        + jnp.dot(rec_ref[1], wb_ref[...], preferred_element_type=jnp.float32)
        + b_ref[...])


# --------------------------------- Forward pass --------------------------------


@functools.partial(jax.jit, static_argnames=("compute_dtype",))
def bidirectional_lstm_forward(features, params, *, compute_dtype=jnp.float32):
    """Equivalent of BidirectionalLSTM.forward(features).

    compute_dtype=jnp.float32 gives PyTorch-exact numerics; jnp.bfloat16 runs
    the MXU matmuls / gate nonlinearities in bf16 (f32 accumulation and f32
    cell state are kept either way).
    """
    T, B, nIn = features.shape
    H = params["wh_f"].shape[0]
    nOut = params["w_emb"].shape[1]
    G = 4 * H

    # Batch padded to a full sublane tile (16 rows for packed bf16, 8 for f32);
    # time padded to a full chunk so awkward/prime T never degrades Tc.
    sub = 8 if jnp.dtype(compute_dtype).itemsize >= 4 else 16
    B_pad = _round_up(B, sub)
    Tc = min(32, T)
    T_pad = _round_up(T, Tc)
    n_chunks = T_pad // Tc
    masked = T_pad != T

    x = features
    if (T_pad, B_pad) != (T, B):
        x = jnp.pad(x, ((0, T_pad - T), (0, B_pad - B), (0, 0)))
    M_pad = T_pad * B_pad
    x2d = x.reshape(M_pad, nIn).astype(compute_dtype)

    # Direction-stacked weights with gate columns permuted (i,f,g,o)->(i,f,o,g).
    def permute_gates(w):
        return jnp.concatenate(
            [w[..., :2 * H], w[..., 3 * H:], w[..., 2 * H:3 * H]], axis=-1)

    wi_all = jnp.stack([permute_gates(params["wi_f"]),
                        permute_gates(params["wi_b"])]).astype(compute_dtype)
    wh_all = jnp.stack([permute_gates(params["wh_f"]),
                        permute_gates(params["wh_b"])]).astype(compute_dtype)
    b_all = jnp.stack([permute_gates(params["b_f"]),
                       permute_gates(params["b_b"])]).astype(jnp.float32)

    def chunk_sel(d, c):
        # d == 0 -> c ; d == 1 -> n_chunks - 1 - c   (pure integer arithmetic)
        return c + d * (n_chunks - 1 - 2 * c)

    out_all = pl.pallas_call(
        functools.partial(_bilstm_kernel, Tc=Tc, B=B_pad, H=H,
                          n_chunks=n_chunks, T_real=T, masked=masked,
                          compute_dtype=compute_dtype),
        out_shape=jax.ShapeDtypeStruct((2, T_pad, B_pad, H), compute_dtype),
        grid_spec=pltpu.PrefetchScalarGridSpec(
            num_scalar_prefetch=0,
            grid=(2, n_chunks),                    # (direction, time chunk)
            in_specs=[
                pl.BlockSpec((Tc * B_pad, nIn),
                             lambda d, c: (chunk_sel(d, c), 0)),
                pl.BlockSpec((None, nIn, G), lambda d, c: (d, 0, 0)),
                pl.BlockSpec((None, H, G), lambda d, c: (d, 0, 0)),
                pl.BlockSpec((None, 1, G), lambda d, c: (d, 0, 0)),
            ],
            out_specs=pl.BlockSpec((None, Tc, B_pad, H),
                                   lambda d, c: (d, chunk_sel(d, c), 0, 0)),
            scratch_shapes=[
                pltpu.VMEM((Tc * B_pad, G), jnp.float32),   # per-chunk gate pre-acts
                pltpu.VMEM((2, B_pad, H), compute_dtype),   # h state, per direction
                pltpu.VMEM((2, B_pad, H), jnp.float32),     # c state, per direction
            ],
        ),
        compiler_params=pltpu.CompilerParams(
            # Direction axis is parallel -> split across the two TensorCores on
            # v7x; the chunk axis is the sequential recurrence.
            dimension_semantics=("parallel", "arbitrary"),
            vmem_limit_bytes=_VMEM_LIMIT_BYTES),
    )(x2d, wi_all, wh_all, b_all)

    rec = out_all.reshape(2, M_pad, H)

    # Final Linear with lane-dense (multiple-of-128) output columns.
    nOut_pad = _round_up(nOut, 128)
    w_f = params["w_emb"][:H]
    w_b = params["w_emb"][H:]
    b_emb = params["b_emb"]
    if nOut_pad != nOut:
        pad = ((0, 0), (0, nOut_pad - nOut))
        w_f, w_b, b_emb = jnp.pad(w_f, pad), jnp.pad(w_b, pad), jnp.pad(b_emb, pad)
    w_f = w_f.astype(compute_dtype)
    w_b = w_b.astype(compute_dtype)

    bm = B_pad * _largest_divisor_leq(T_pad, max(1, 512 // B_pad))
    out_pad = pl.pallas_call(
        _linear_kernel,
        out_shape=jax.ShapeDtypeStruct((M_pad, nOut_pad), jnp.float32),
        grid=(M_pad // bm,),
        in_specs=[pl.BlockSpec((2, bm, H), lambda i: (0, i, 0)),
                  pl.BlockSpec((H, nOut_pad), lambda i: (0, 0)),
                  pl.BlockSpec((H, nOut_pad), lambda i: (0, 0)),
                  pl.BlockSpec((1, nOut_pad), lambda i: (0, 0))],
        out_specs=pl.BlockSpec((bm, nOut_pad), lambda i: (i, 0)),
        compiler_params=pltpu.CompilerParams(
            dimension_semantics=("parallel",),
            vmem_limit_bytes=_VMEM_LIMIT_BYTES),
    )(rec, w_f, w_b, b_emb)

    return out_pad[:, :nOut].reshape(T_pad, B_pad, nOut)[:T, :B, :]


# ------------------------------ Pure-JAX reference -----------------------------


def bidirectional_lstm_ref(features, params):
    T, B, _ = features.shape
    H = params["wh_f"].shape[0]

    def make_cell(wi, wh, b):
        def cell(carry, xt):
            h, c = carry
            gates = xt @ wi + h @ wh + b
            i = jax.nn.sigmoid(gates[:, :H])
            f = jax.nn.sigmoid(gates[:, H:2 * H])
            g = jnp.tanh(gates[:, 2 * H:3 * H])
            o = jax.nn.sigmoid(gates[:, 3 * H:])
            c = f * c + i * g
            h = o * jnp.tanh(c)
            return (h, c), h
        return cell

    init = (jnp.zeros((B, H), jnp.float32), jnp.zeros((B, H), jnp.float32))
    _, hs_f = jax.lax.scan(
        make_cell(params["wi_f"], params["wh_f"], params["b_f"]), init, features)
    _, hs_b = jax.lax.scan(
        make_cell(params["wi_b"], params["wh_b"], params["b_b"]), init,
        features[::-1])
    hs_b = hs_b[::-1]
    rec = jnp.concatenate([hs_f, hs_b], axis=-1)
    out = rec.reshape(T * B, 2 * H) @ params["w_emb"] + params["b_emb"]
    return out.reshape(T, B, -1)


# ------------------------------ Parameter init ---------------------------------


def init_params(key, nIn, nHidden, nOut):
    """Synthetic params, stored transposed for the kernels: wi_* (nIn, 4H),
    wh_* (H, 4H), biases (1, 4H) with b = b_ih + b_hh (PyTorch LSTM applies two
    biases; their sum is equivalent).  Gate order i, f, g, o (PyTorch)."""
    H = nHidden
    k = 1.0 / jnp.sqrt(jnp.float32(H))
    keys = jax.random.split(key, 8)

    def u(kk, shape):
        return jax.random.uniform(kk, shape, jnp.float32, -k, k)

    return {
        "wi_f": u(keys[0], (nIn, 4 * H)),
        "wh_f": u(keys[1], (H, 4 * H)),
        "b_f": u(keys[2], (1, 4 * H)),
        "wi_b": u(keys[3], (nIn, 4 * H)),
        "wh_b": u(keys[4], (H, 4 * H)),
        "b_b": u(keys[5], (1, 4 * H)),
        "w_emb": u(keys[6], (2 * H, nOut)),
        "b_emb": u(keys[7], (1, nOut)),
    }


# ------------------------------------- Main -------------------------------------


if __name__ == "__main__":
    T, B, nIn, nHidden, nOut = 8, 2, 16, 32, 16

    key = jax.random.PRNGKey(0)
    k_x, k_p = jax.random.split(key)
    features = jax.random.normal(k_x, (T, B, nIn), jnp.float32)
    params = init_params(k_p, nIn, nHidden, nOut)

    ref = jax.block_until_ready(bidirectional_lstm_ref(features, params))

    # f32 path: PyTorch-exact semantics.
    out = jax.block_until_ready(
        bidirectional_lstm_forward(features, params, compute_dtype=jnp.float32))
    assert out.shape == (T, B, nOut), out.shape
    assert jnp.allclose(out, ref, atol=1e-4, rtol=1e-4), (
        float(jnp.max(jnp.abs(out - ref))))

    # bf16 MXU / activation path (perf-review item): looser tolerance.
    out_bf16 = jax.block_until_ready(
        bidirectional_lstm_forward(features, params, compute_dtype=jnp.bfloat16))
    assert jnp.allclose(out_bf16, ref, atol=5e-2, rtol=5e-2), (
        float(jnp.max(jnp.abs(out_bf16 - ref))))

    # A T that does not divide the chunk size: exercises time padding plus the
    # backward-direction masking.
    T2 = 37
    feats2 = jax.random.normal(jax.random.PRNGKey(1), (T2, B, nIn), jnp.float32)
    out2 = jax.block_until_ready(
        bidirectional_lstm_forward(feats2, params, compute_dtype=jnp.float32))
    ref2 = bidirectional_lstm_ref(feats2, params)
    assert out2.shape == (T2, B, nOut), out2.shape
    assert jnp.allclose(out2, ref2, atol=1e-4, rtol=1e-4), (
        float(jnp.max(jnp.abs(out2 - ref2))))

    print("KERNEL_OK")
</pallas_src>

<mosaic_0001>
module attributes {stable_mosaic.version = 11 : i64} {
  func.func @_bilstm_kernel(%arg0: i32, %arg1: i32, %arg2: memref<64x16xf32, #tpu.memory_space<vmem>>, %arg3: memref<1x16x128xf32, #tpu.memory_space<vmem>>, %arg4: memref<1x32x128xf32, #tpu.memory_space<vmem>>, %arg5: memref<1x1x128xf32, #tpu.memory_space<vmem>>, %arg6: memref<1x8x8x32xf32, #tpu.memory_space<vmem>>, %arg7: memref<64x128xf32, #tpu.memory_space<vmem>>, %arg8: memref<2x8x32xf32, #tpu.memory_space<vmem>>, %arg9: memref<2x8x32xf32, #tpu.memory_space<vmem>>) attributes {dimension_semantics = [#tpu.dimension_semantics<parallel>, #tpu.dimension_semantics<arbitrary>], iteration_bounds = array<i64: 2, 1>, scalar_prefetch = 0 : i64, scratch_operands = 3 : i64, tpu.core_type = #tpu.core_type<tc>, window_params = [{transform_indices = @transform_0, window_bounds = array<i64: 64, 16>}, {transform_indices = @transform_1, window_bounds = array<i64: 1, 16, 128>}, {transform_indices = @transform_2, window_bounds = array<i64: 1, 32, 128>}, {transform_indices = @transform_3, window_bounds = array<i64: 1, 1, 128>}, {transform_indices = @transform_4, window_bounds = array<i64: 1, 8, 8, 32>}]} {
    %c0_i32 = arith.constant 0 : i32
    %0 = arith.cmpi eq, %arg1, %c0_i32 : i32
    %1 = arith.extui %0 : i1 to i32
    %c0_i32_0 = arith.constant 0 : i32
    %2 = arith.cmpi ne, %1, %c0_i32_0 : i32
    scf.if %2 {
      %cst_115 = arith.constant 0.000000e+00 : f32
      %282 = vector.broadcast %cst_115 : f32 to vector<8x32xf32>
      %283 = arith.index_cast %arg0 : i32 to index
      %c0_116 = arith.constant 0 : index
      %c0_117 = arith.constant 0 : index
      %284 = vector.load %arg8[%283, %c0_116, %c0_117] : memref<2x8x32xf32, #tpu.memory_space<vmem>>, vector<1x8x32xf32>
      %285 = vector.shape_cast %284 : vector<1x8x32xf32> to vector<8x32xf32>
      %286 = vector.shape_cast %282 : vector<8x32xf32> to vector<1x8x32xf32>
      tpu.vector_store %arg8[%283, %c0_116, %c0_117], %286 {strides = array<i32>} : memref<2x8x32xf32, #tpu.memory_space<vmem>>, vector<1x8x32xf32>,
      %cst_118 = arith.constant 0.000000e+00 : f32
      %287 = vector.broadcast %cst_118 : f32 to vector<8x32xf32>
      %288 = arith.index_cast %arg0 : i32 to index
      %c0_119 = arith.constant 0 : index
      %c0_120 = arith.constant 0 : index
      %289 = vector.load %arg9[%288, %c0_119, %c0_120] : memref<2x8x32xf32, #tpu.memory_space<vmem>>, vector<1x8x32xf32>
      %290 = vector.shape_cast %289 : vector<1x8x32xf32> to vector<8x32xf32>
      %291 = vector.shape_cast %287 : vector<8x32xf32> to vector<1x8x32xf32>
      tpu.vector_store %arg9[%288, %c0_119, %c0_120], %291 {strides = array<i32>} : memref<2x8x32xf32, #tpu.memory_space<vmem>>, vector<1x8x32xf32>,
    } else {
    }
    %c0 = arith.constant 0 : index
    %c0_1 = arith.constant 0 : index
    %3 = vector.load %arg2[%c0, %c0_1] : memref<64x16xf32, #tpu.memory_space<vmem>>, vector<64x16xf32>
    %c0_2 = arith.constant 0 : index
    %c0_3 = arith.constant 0 : index
    %c0_4 = arith.constant 0 : index
    %4 = vector.load %arg3[%c0_2, %c0_3, %c0_4] : memref<1x16x128xf32, #tpu.memory_space<vmem>>, vector<1x16x128xf32>
    %5 = vector.shape_cast %4 : vector<1x16x128xf32> to vector<16x128xf32>
    %cst = arith.constant dense<0.000000e+00> : vector<64x128xf32>
    %6 = tpu.matmul %3, %5, %cst {dimension_numbers = #tpu.dot_dimension_numbers<[1], [0], [0], [1], [0, 0, 1, 1], [], []>} : vector<64x16xf32>, vector<16x128xf32>, vector<64x128xf32> -> vector<64x128xf32>
    %c0_5 = arith.constant 0 : index
    %c0_6 = arith.constant 0 : index
    %c0_7 = arith.constant 0 : index
    %7 = vector.load %arg5[%c0_5, %c0_6, %c0_7] : memref<1x1x128xf32, #tpu.memory_space<vmem>>, vector<1x1x128xf32>
    %8 = vector.shape_cast %7 : vector<1x1x128xf32> to vector<1x128xf32>
    %9 = vector.broadcast %8 : vector<1x128xf32> to vector<64x128xf32>
    %10 = arith.addf %6, %9 : vector<64x128xf32>
    %c0_8 = arith.constant 0 : index
    %c0_9 = arith.constant 0 : index
    %11 = vector.load %arg7[%c0_8, %c0_9] : memref<64x128xf32, #tpu.memory_space<vmem>>, vector<64x128xf32>
    tpu.vector_store %arg7[%c0_8, %c0_9], %10 {strides = array<i32>} : memref<64x128xf32, #tpu.memory_space<vmem>>, vector<64x128xf32>,
    %12 = arith.index_cast %arg0 : i32 to index
    %c0_10 = arith.constant 0 : index
    %c0_11 = arith.constant 0 : index
    %13 = vector.load %arg8[%12, %c0_10, %c0_11] : memref<2x8x32xf32, #tpu.memory_space<vmem>>, vector<1x8x32xf32>
    %14 = vector.shape_cast %13 : vector<1x8x32xf32> to vector<8x32xf32>
    %15 = arith.index_cast %arg0 : i32 to index
    %c0_12 = arith.constant 0 : index
    %c0_13 = arith.constant 0 : index
    %16 = vector.load %arg9[%15, %c0_12, %c0_13] : memref<2x8x32xf32, #tpu.memory_space<vmem>>, vector<1x8x32xf32>
    %17 = vector.shape_cast %16 : vector<1x8x32xf32> to vector<8x32xf32>
    %c0_i32_14 = arith.constant 0 : i32
    %c2_i32 = arith.constant 2 : i32
    %18 = arith.muli %c2_i32, %c0_i32_14 : i32
    %c7_i32 = arith.constant 7 : i32
    %19 = arith.subi %c7_i32, %18 : i32
    %20 = arith.muli %arg0, %19 : i32
    %21 = arith.addi %c0_i32_14, %20 : i32
    %c8_i32 = arith.constant 8 : i32
    %22 = arith.muli %21, %c8_i32 : i32
    %23 = tpu.assume_multiple %22, 8 : i32
    %c0_15 = arith.constant 0 : index
    %c0_16 = arith.constant 0 : index
    %c0_17 = arith.constant 0 : index
    %24 = vector.load %arg4[%c0_15, %c0_16, %c0_17] : memref<1x32x128xf32, #tpu.memory_space<vmem>>, vector<1x32x128xf32>
    %25 = vector.shape_cast %24 : vector<1x32x128xf32> to vector<32x128xf32>
    %cst_18 = arith.constant dense<0.000000e+00> : vector<8x128xf32>
    %26 = tpu.matmul %14, %25, %cst_18 {dimension_numbers = #tpu.dot_dimension_numbers<[1], [0], [0], [1], [0, 0, 1, 1], [], []>} : vector<8x32xf32>, vector<32x128xf32>, vector<8x128xf32> -> vector<8x128xf32>
    %27 = arith.index_cast %23 : i32 to index
    %c0_19 = arith.constant 0 : index
    %28 = vector.load %arg7[%27, %c0_19] : memref<64x128xf32, #tpu.memory_space<vmem>>, vector<8x128xf32>
    %29 = arith.addf %26, %28 : vector<8x128xf32>
    %30 = vector.extract_strided_slice %29 {offsets = [0, 0], sizes = [8, 96], strides = [1, 1]} : vector<8x128xf32> to vector<8x96xf32>
    %31 = arith.negf %30 : vector<8x96xf32>
    %32 = math.exp %31 : vector<8x96xf32>
    %cst_20 = arith.constant 1.000000e+00 : f32
    %33 = vector.broadcast %cst_20 : f32 to vector<8x96xf32>
    %34 = arith.addf %33, %32 : vector<8x96xf32>
    %35 = arith.divf %33, %34 : vector<8x96xf32>
    %36 = vector.extract_strided_slice %29 {offsets = [0, 96], sizes = [8, 32], strides = [1, 1]} : vector<8x128xf32> to vector<8x32xf32>
    %37 = math.tanh %36 : vector<8x32xf32>
    %38 = vector.extract_strided_slice %35 {offsets = [0, 32], sizes = [8, 32], strides = [1, 1]} : vector<8x96xf32> to vector<8x32xf32>
    %39 = arith.mulf %38, %17 : vector<8x32xf32>
    %40 = vector.extract_strided_slice %35 {offsets = [0, 0], sizes = [8, 32], strides = [1, 1]} : vector<8x96xf32> to vector<8x32xf32>
    %41 = arith.mulf %40, %37 : vector<8x32xf32>
    %42 = arith.addf %39, %41 : vector<8x32xf32>
    %43 = vector.extract_strided_slice %35 {offsets = [0, 64], sizes = [8, 32], strides = [1, 1]} : vector<8x96xf32> to vector<8x32xf32>
    %44 = math.tanh %42 : vector<8x32xf32>
    %45 = arith.mulf %43, %44 : vector<8x32xf32>
    %c0_21 = arith.constant 0 : index
    %46 = arith.index_cast %21 : i32 to index
    %c0_22 = arith.constant 0 : index
    %c0_23 = arith.constant 0 : index
    %47 = vector.load %arg6[%c0_21, %46, %c0_22, %c0_23] : memref<1x8x8x32xf32, #tpu.memory_space<vmem>>, vector<1x1x8x32xf32>
    %48 = vector.shape_cast %47 : vector<1x1x8x32xf32> to vector<8x32xf32>
    %49 = vector.shape_cast %45 : vector<8x32xf32> to vector<1x1x8x32xf32>
    tpu.vector_store %arg6[%c0_21, %46, %c0_22, %c0_23], %49 {strides = array<i32>} : memref<1x8x8x32xf32, #tpu.memory_space<vmem>>, vector<1x1x8x32xf32>,
    %c1_i32 = arith.constant 1 : i32
    %c2_i32_24 = arith.constant 2 : i32
    %50 = arith.muli %c2_i32_24, %c1_i32 : i32
    %c7_i32_25 = arith.constant 7 : i32
    %51 = arith.subi %c7_i32_25, %50 : i32
    %52 = arith.muli %arg0, %51 : i32
    %53 = arith.addi %c1_i32, %52 : i32
    %c8_i32_26 = arith.constant 8 : i32
    %54 = arith.muli %53, %c8_i32_26 : i32
    %55 = tpu.assume_multiple %54, 8 : i32
    %c0_27 = arith.constant 0 : index
    %c0_28 = arith.constant 0 : index
    %c0_29 = arith.constant 0 : index
    %56 = vector.load %arg4[%c0_27, %c0_28, %c0_29] : memref<1x32x128xf32, #tpu.memory_space<vmem>>, vector<1x32x128xf32>
    %57 = vector.shape_cast %56 : vector<1x32x128xf32> to vector<32x128xf32>
    %cst_30 = arith.constant dense<0.000000e+00> : vector<8x128xf32>
    %58 = tpu.matmul %45, %57, %cst_30 {dimension_numbers = #tpu.dot_dimension_numbers<[1], [0], [0], [1], [0, 0, 1, 1], [], []>} : vector<8x32xf32>, vector<32x128xf32>, vector<8x128xf32> -> vector<8x128xf32>
    %59 = arith.index_cast %55 : i32 to index
    %c0_31 = arith.constant 0 : index
    %60 = vector.load %arg7[%59, %c0_31] : memref<64x128xf32, #tpu.memory_space<vmem>>, vector<8x128xf32>
    %61 = arith.addf %58, %60 : vector<8x128xf32>
    %62 = vector.extract_strided_slice %61 {offsets = [0, 0], sizes = [8, 96], strides = [1, 1]} : vector<8x128xf32> to vector<8x96xf32>
    %63 = arith.negf %62 : vector<8x96xf32>
    %64 = math.exp %63 : vector<8x96xf32>
    %cst_32 = arith.constant 1.000000e+00 : f32
    %65 = vector.broadcast %cst_32 : f32 to vector<8x96xf32>
    %66 = arith.addf %65, %64 : vector<8x96xf32>
    %67 = arith.divf %65, %66 : vector<8x96xf32>
    %68 = vector.extract_strided_slice %61 {offsets = [0, 96], sizes = [8, 32], strides = [1, 1]} : vector<8x128xf32> to vector<8x32xf32>
    %69 = math.tanh %68 : vector<8x32xf32>
    %70 = vector.extract_strided_slice %67 {offsets = [0, 32], sizes = [8, 32], strides = [1, 1]} : vector<8x96xf32> to vector<8x32xf32>
    %71 = arith.mulf %70, %42 : vector<8x32xf32>
    %72 = vector.extract_strided_slice %67 {offsets = [0, 0], sizes = [8, 32], strides = [1, 1]} : vector<8x96xf32> to vector<8x32xf32>
    %73 = arith.mulf %72, %69 : vector<8x32xf32>
    %74 = arith.addf %71, %73 : vector<8x32xf32>
    %75 = vector.extract_strided_slice %67 {offsets = [0, 64], sizes = [8, 32], strides = [1, 1]} : vector<8x96xf32> to vector<8x32xf32>
    %76 = math.tanh %74 : vector<8x32xf32>
    %77 = arith.mulf %75, %76 : vector<8x32xf32>
    %c0_33 = arith.constant 0 : index
    %78 = arith.index_cast %53 : i32 to index
    %c0_34 = arith.constant 0 : index
    %c0_35 = arith.constant 0 : index
    %79 = vector.load %arg6[%c0_33, %78, %c0_34, %c0_35] : memref<1x8x8x32xf32, #tpu.memory_space<vmem>>, vector<1x1x8x32xf32>
    %80 = vector.shape_cast %79 : vector<1x1x8x32xf32> to vector<8x32xf32>
    %81 = vector.shape_cast %77 : vector<8x32xf32> to vector<1x1x8x32xf32>
    tpu.vector_store %arg6[%c0_33, %78, %c0_34, %c0_35], %81 {strides = array<i32>} : memref<1x8x8x32xf32, #tpu.memory_space<vmem>>, vector<1x1x8x32xf32>,
    %c2_i32_36 = arith.constant 2 : i32
    %c2_i32_37 = arith.constant 2 : i32
    %82 = arith.muli %c2_i32_37, %c2_i32_36 : i32
    %c7_i32_38 = arith.constant 7 : i32
    %83 = arith.subi %c7_i32_38, %82 : i32
    %84 = arith.muli %arg0, %83 : i32
    %85 = arith.addi %c2_i32_36, %84 : i32
    %c8_i32_39 = arith.constant 8 : i32
    %86 = arith.muli %85, %c8_i32_39 : i32
    %87 = tpu.assume_multiple %86, 8 : i32
    %c0_40 = arith.constant 0 : index
    %c0_41 = arith.constant 0 : index
    %c0_42 = arith.constant 0 : index
    %88 = vector.load %arg4[%c0_40, %c0_41, %c0_42] : memref<1x32x128xf32, #tpu.memory_space<vmem>>, vector<1x32x128xf32>
    %89 = vector.shape_cast %88 : vector<1x32x128xf32> to vector<32x128xf32>
    %cst_43 = arith.constant dense<0.000000e+00> : vector<8x128xf32>
    %90 = tpu.matmul %77, %89, %cst_43 {dimension_numbers = #tpu.dot_dimension_numbers<[1], [0], [0], [1], [0, 0, 1, 1], [], []>} : vector<8x32xf32>, vector<32x128xf32>, vector<8x128xf32> -> vector<8x128xf32>
    %91 = arith.index_cast %87 : i32 to index
    %c0_44 = arith.constant 0 : index
    %92 = vector.load %arg7[%91, %c0_44] : memref<64x128xf32, #tpu.memory_space<vmem>>, vector<8x128xf32>
    %93 = arith.addf %90, %92 : vector<8x128xf32>
    %94 = vector.extract_strided_slice %93 {offsets = [0, 0], sizes = [8, 96], strides = [1, 1]} : vector<8x128xf32> to vector<8x96xf32>
    %95 = arith.negf %94 : vector<8x96xf32>
    %96 = math.exp %95 : vector<8x96xf32>
    %cst_45 = arith.constant 1.000000e+00 : f32
    %97 = vector.broadcast %cst_45 : f32 to vector<8x96xf32>
    %98 = arith.addf %97, %96 : vector<8x96xf32>
    %99 = arith.divf %97, %98 : vector<8x96xf32>
    %100 = vector.extract_strided_slice %93 {offsets = [0, 96], sizes = [8, 32], strides = [1, 1]} : vector<8x128xf32> to vector<8x32xf32>
    %101 = math.tanh %100 : vector<8x32xf32>
    %102 = vector.extract_strided_slice %99 {offsets = [0, 32], sizes = [8, 32], strides = [1, 1]} : vector<8x96xf32> to vector<8x32xf32>
    %103 = arith.mulf %102, %74 : vector<8x32xf32>
    %104 = vector.extract_strided_slice %99 {offsets = [0, 0], sizes = [8, 32], strides = [1, 1]} : vector<8x96xf32> to vector<8x32xf32>
    %105 = arith.mulf %104, %101 : vector<8x32xf32>
    %106 = arith.addf %103, %105 : vector<8x32xf32>
    %107 = vector.extract_strided_slice %99 {offsets = [0, 64], sizes = [8, 32], strides = [1, 1]} : vector<8x96xf32> to vector<8x32xf32>
    %108 = math.tanh %106 : vector<8x32xf32>
    %109 = arith.mulf %107, %108 : vector<8x32xf32>
    %c0_46 = arith.constant 0 : index
    %110 = arith.index_cast %85 : i32 to index
    %c0_47 = arith.constant 0 : index
    %c0_48 = arith.constant 0 : index
    %111 = vector.load %arg6[%c0_46, %110, %c0_47, %c0_48] : memref<1x8x8x32xf32, #tpu.memory_space<vmem>>, vector<1x1x8x32xf32>
    %112 = vector.shape_cast %111 : vector<1x1x8x32xf32> to vector<8x32xf32>
    %113 = vector.shape_cast %109 : vector<8x32xf32> to vector<1x1x8x32xf32>
    tpu.vector_store %arg6[%c0_46, %110, %c0_47, %c0_48], %113 {strides = array<i32>} : memref<1x8x8x32xf32, #tpu.memory_space<vmem>>, vector<1x1x8x32xf32>,
    %c3_i32 = arith.constant 3 : i32
    %c2_i32_49 = arith.constant 2 : i32
    %114 = arith.muli %c2_i32_49, %c3_i32 : i32
    %c7_i32_50 = arith.constant 7 : i32
    %115 = arith.subi %c7_i32_50, %114 : i32
    %116 = arith.muli %arg0, %115 : i32
    %117 = arith.addi %c3_i32, %116 : i32
    %c8_i32_51 = arith.constant 8 : i32
    %118 = arith.muli %117, %c8_i32_51 : i32
    %119 = tpu.assume_multiple %118, 8 : i32
    %c0_52 = arith.constant 0 : index
    %c0_53 = arith.constant 0 : index
    %c0_54 = arith.constant 0 : index
    %120 = vector.load %arg4[%c0_52, %c0_53, %c0_54] : memref<1x32x128xf32, #tpu.memory_space<vmem>>, vector<1x32x128xf32>
    %121 = vector.shape_cast %120 : vector<1x32x128xf32> to vector<32x128xf32>
    %cst_55 = arith.constant dense<0.000000e+00> : vector<8x128xf32>
    %122 = tpu.matmul %109, %121, %cst_55 {dimension_numbers = #tpu.dot_dimension_numbers<[1], [0], [0], [1], [0, 0, 1, 1], [], []>} : vector<8x32xf32>, vector<32x128xf32>, vector<8x128xf32> -> vector<8x128xf32>
    %123 = arith.index_cast %119 : i32 to index
    %c0_56 = arith.constant 0 : index
    %124 = vector.load %arg7[%123, %c0_56] : memref<64x128xf32, #tpu.memory_space<vmem>>, vector<8x128xf32>
    %125 = arith.addf %122, %124 : vector<8x128xf32>
    %126 = vector.extract_strided_slice %125 {offsets = [0, 0], sizes = [8, 96], strides = [1, 1]} : vector<8x128xf32> to vector<8x96xf32>
    %127 = arith.negf %126 : vector<8x96xf32>
    %128 = math.exp %127 : vector<8x96xf32>
    %cst_57 = arith.constant 1.000000e+00 : f32
    %129 = vector.broadcast %cst_57 : f32 to vector<8x96xf32>
    %130 = arith.addf %129, %128 : vector<8x96xf32>
    %131 = arith.divf %129, %130 : vector<8x96xf32>
    %132 = vector.extract_strided_slice %125 {offsets = [0, 96], sizes = [8, 32], strides = [1, 1]} : vector<8x128xf32> to vector<8x32xf32>
    %133 = math.tanh %132 : vector<8x32xf32>
    %134 = vector.extract_strided_slice %131 {offsets = [0, 32], sizes = [8, 32], strides = [1, 1]} : vector<8x96xf32> to vector<8x32xf32>
    %135 = arith.mulf %134, %106 : vector<8x32xf32>
    %136 = vector.extract_strided_slice %131 {offsets = [0, 0], sizes = [8, 32], strides = [1, 1]} : vector<8x96xf32> to vector<8x32xf32>
    %137 = arith.mulf %136, %133 : vector<8x32xf32>
    %138 = arith.addf %135, %137 : vector<8x32xf32>
    %139 = vector.extract_strided_slice %131 {offsets = [0, 64], sizes = [8, 32], strides = [1, 1]} : vector<8x96xf32> to vector<8x32xf32>
    %140 = math.tanh %138 : vector<8x32xf32>
    %141 = arith.mulf %139, %140 : vector<8x32xf32>
    %c0_58 = arith.constant 0 : index
    %142 = arith.index_cast %117 : i32 to index
    %c0_59 = arith.constant 0 : index
    %c0_60 = arith.constant 0 : index
    %143 = vector.load %arg6[%c0_58, %142, %c0_59, %c0_60] : memref<1x8x8x32xf32, #tpu.memory_space<vmem>>, vector<1x1x8x32xf32>
    %144 = vector.shape_cast %143 : vector<1x1x8x32xf32> to vector<8x32xf32>
    %145 = vector.shape_cast %141 : vector<8x32xf32> to vector<1x1x8x32xf32>
    tpu.vector_store %arg6[%c0_58, %142, %c0_59, %c0_60], %145 {strides = array<i32>} : memref<1x8x8x32xf32, #tpu.memory_space<vmem>>, vector<1x1x8x32xf32>,
    %c4_i32 = arith.constant 4 : i32
    %c2_i32_61 = arith.constant 2 : i32
    %146 = arith.muli %c2_i32_61, %c4_i32 : i32
    %c7_i32_62 = arith.constant 7 : i32
    %147 = arith.subi %c7_i32_62, %146 : i32
    %148 = arith.muli %arg0, %147 : i32
    %149 = arith.addi %c4_i32, %148 : i32
    %c8_i32_63 = arith.constant 8 : i32
    %150 = arith.muli %149, %c8_i32_63 : i32
    %151 = tpu.assume_multiple %150, 8 : i32
    %c0_64 = arith.constant 0 : index
    %c0_65 = arith.constant 0 : index
    %c0_66 = arith.constant 0 : index
    %152 = vector.load %arg4[%c0_64, %c0_65, %c0_66] : memref<1x32x128xf32, #tpu.memory_space<vmem>>, vector<1x32x128xf32>
    %153 = vector.shape_cast %152 : vector<1x32x128xf32> to vector<32x128xf32>
    %cst_67 = arith.constant dense<0.000000e+00> : vector<8x128xf32>
    %154 = tpu.matmul %141, %153, %cst_67 {dimension_numbers = #tpu.dot_dimension_numbers<[1], [0], [0], [1], [0, 0, 1, 1], [], []>} : vector<8x32xf32>, vector<32x128xf32>, vector<8x128xf32> -> vector<8x128xf32>
    %155 = arith.index_cast %151 : i32 to index
    %c0_68 = arith.constant 0 : index
    %156 = vector.load %arg7[%155, %c0_68] : memref<64x128xf32, #tpu.memory_space<vmem>>, vector<8x128xf32>
    %157 = arith.addf %154, %156 : vector<8x128xf32>
    %158 = vector.extract_strided_slice %157 {offsets = [0, 0], sizes = [8, 96], strides = [1, 1]} : vector<8x128xf32> to vector<8x96xf32>
    %159 = arith.negf %158 : vector<8x96xf32>
    %160 = math.exp %159 : vector<8x96xf32>
    %cst_69 = arith.constant 1.000000e+00 : f32
    %161 = vector.broadcast %cst_69 : f32 to vector<8x96xf32>
    %162 = arith.addf %161, %160 : vector<8x96xf32>
    %163 = arith.divf %161, %162 : vector<8x96xf32>
    %164 = vector.extract_strided_slice %157 {offsets = [0, 96], sizes = [8, 32], strides = [1, 1]} : vector<8x128xf32> to vector<8x32xf32>
    %165 = math.tanh %164 : vector<8x32xf32>
    %166 = vector.extract_strided_slice %163 {offsets = [0, 32], sizes = [8, 32], strides = [1, 1]} : vector<8x96xf32> to vector<8x32xf32>
    %167 = arith.mulf %166, %138 : vector<8x32xf32>
    %168 = vector.extract_strided_slice %163 {offsets = [0, 0], sizes = [8, 32], strides = [1, 1]} : vector<8x96xf32> to vector<8x32xf32>
    %169 = arith.mulf %168, %165 : vector<8x32xf32>
    %170 = arith.addf %167, %169 : vector<8x32xf32>
    %171 = vector.extract_strided_slice %163 {offsets = [0, 64], sizes = [8, 32], strides = [1, 1]} : vector<8x96xf32> to vector<8x32xf32>
    %172 = math.tanh %170 : vector<8x32xf32>
    %173 = arith.mulf %171, %172 : vector<8x32xf32>
    %c0_70 = arith.constant 0 : index
    %174 = arith.index_cast %149 : i32 to index
    %c0_71 = arith.constant 0 : index
    %c0_72 = arith.constant 0 : index
    %175 = vector.load %arg6[%c0_70, %174, %c0_71, %c0_72] : memref<1x8x8x32xf32, #tpu.memory_space<vmem>>, vector<1x1x8x32xf32>
    %176 = vector.shape_cast %175 : vector<1x1x8x32xf32> to vector<8x32xf32>
    %177 = vector.shape_cast %173 : vector<8x32xf32> to vector<1x1x8x32xf32>
    tpu.vector_store %arg6[%c0_70, %174, %c0_71, %c0_72], %177 {strides = array<i32>} : memref<1x8x8x32xf32, #tpu.memory_space<vmem>>, vector<1x1x8x32xf32>,
    %c5_i32 = arith.constant 5 : i32
    %c2_i32_73 = arith.constant 2 : i32
    %178 = arith.muli %c2_i32_73, %c5_i32 : i32
    %c7_i32_74 = arith.constant 7 : i32
    %179 = arith.subi %c7_i32_74, %178 : i32
    %180 = arith.muli %arg0, %179 : i32
    %181 = arith.addi %c5_i32, %180 : i32
    %c8_i32_75 = arith.constant 8 : i32
    %182 = arith.muli %181, %c8_i32_75 : i32
    %183 = tpu.assume_multiple %182, 8 : i32
    %c0_76 = arith.constant 0 : index
    %c0_77 = arith.constant 0 : index
    %c0_78 = arith.constant 0 : index
    %184 = vector.load %arg4[%c0_76, %c0_77, %c0_78] : memref<1x32x128xf32, #tpu.memory_space<vmem>>, vector<1x32x128xf32>
    %185 = vector.shape_cast %184 : vector<1x32x128xf32> to vector<32x128xf32>
    %cst_79 = arith.constant dense<0.000000e+00> : vector<8x128xf32>
    %186 = tpu.matmul %173, %185, %cst_79 {dimension_numbers = #tpu.dot_dimension_numbers<[1], [0], [0], [1], [0, 0, 1, 1], [], []>} : vector<8x32xf32>, vector<32x128xf32>, vector<8x128xf32> -> vector<8x128xf32>
    %187 = arith.index_cast %183 : i32 to index
    %c0_80 = arith.constant 0 : index
    %188 = vector.load %arg7[%187, %c0_80] : memref<64x128xf32, #tpu.memory_space<vmem>>, vector<8x128xf32>
    %189 = arith.addf %186, %188 : vector<8x128xf32>
    %190 = vector.extract_strided_slice %189 {offsets = [0, 0], sizes = [8, 96], strides = [1, 1]} : vector<8x128xf32> to vector<8x96xf32>
    %191 = arith.negf %190 : vector<8x96xf32>
    %192 = math.exp %191 : vector<8x96xf32>
    %cst_81 = arith.constant 1.000000e+00 : f32
    %193 = vector.broadcast %cst_81 : f32 to vector<8x96xf32>
    %194 = arith.addf %193, %192 : vector<8x96xf32>
    %195 = arith.divf %193, %194 : vector<8x96xf32>
    %196 = vector.extract_strided_slice %189 {offsets = [0, 96], sizes = [8, 32], strides = [1, 1]} : vector<8x128xf32> to vector<8x32xf32>
    %197 = math.tanh %196 : vector<8x32xf32>
    %198 = vector.extract_strided_slice %195 {offsets = [0, 32], sizes = [8, 32], strides = [1, 1]} : vector<8x96xf32> to vector<8x32xf32>
    %199 = arith.mulf %198, %170 : vector<8x32xf32>
    %200 = vector.extract_strided_slice %195 {offsets = [0, 0], sizes = [8, 32], strides = [1, 1]} : vector<8x96xf32> to vector<8x32xf32>
    %201 = arith.mulf %200, %197 : vector<8x32xf32>
    %202 = arith.addf %199, %201 : vector<8x32xf32>
    %203 = vector.extract_strided_slice %195 {offsets = [0, 64], sizes = [8, 32], strides = [1, 1]} : vector<8x96xf32> to vector<8x32xf32>
    %204 = math.tanh %202 : vector<8x32xf32>
    %205 = arith.mulf %203, %204 : vector<8x32xf32>
    %c0_82 = arith.constant 0 : index
    %206 = arith.index_cast %181 : i32 to index
    %c0_83 = arith.constant 0 : index
    %c0_84 = arith.constant 0 : index
    %207 = vector.load %arg6[%c0_82, %206, %c0_83, %c0_84] : memref<1x8x8x32xf32, #tpu.memory_space<vmem>>, vector<1x1x8x32xf32>
    %208 = vector.shape_cast %207 : vector<1x1x8x32xf32> to vector<8x32xf32>
    %209 = vector.shape_cast %205 : vector<8x32xf32> to vector<1x1x8x32xf32>
    tpu.vector_store %arg6[%c0_82, %206, %c0_83, %c0_84], %209 {strides = array<i32>} : memref<1x8x8x32xf32, #tpu.memory_space<vmem>>, vector<1x1x8x32xf32>,
    %c6_i32 = arith.constant 6 : i32
    %c2_i32_85 = arith.constant 2 : i32
    %210 = arith.muli %c2_i32_85, %c6_i32 : i32
    %c7_i32_86 = arith.constant 7 : i32
    %211 = arith.subi %c7_i32_86, %210 : i32
    %212 = arith.muli %arg0, %211 : i32
    %213 = arith.addi %c6_i32, %212 : i32
    %c8_i32_87 = arith.constant 8 : i32
    %214 = arith.muli %213, %c8_i32_87 : i32
    %215 = tpu.assume_multiple %214, 8 : i32
    %c0_88 = arith.constant 0 : index
    %c0_89 = arith.constant 0 : index
    %c0_90 = arith.constant 0 : index
    %216 = vector.load %arg4[%c0_88, %c0_89, %c0_90] : memref<1x32x128xf32, #tpu.memory_space<vmem>>, vector<1x32x128xf32>
    %217 = vector.shape_cast %216 : vector<1x32x128xf32> to vector<32x128xf32>
    %cst_91 = arith.constant dense<0.000000e+00> : vector<8x128xf32>
    %218 = tpu.matmul %205, %217, %cst_91 {dimension_numbers = #tpu.dot_dimension_numbers<[1], [0], [0], [1], [0, 0, 1, 1], [], []>} : vector<8x32xf32>, vector<32x128xf32>, vector<8x128xf32> -> vector<8x128xf32>
    %219 = arith.index_cast %215 : i32 to index
    %c0_92 = arith.constant 0 : index
    %220 = vector.load %arg7[%219, %c0_92] : memref<64x128xf32, #tpu.memory_space<vmem>>, vector<8x128xf32>
    %221 = arith.addf %218, %220 : vector<8x128xf32>
    %222 = vector.extract_strided_slice %221 {offsets = [0, 0], sizes = [8, 96], strides = [1, 1]} : vector<8x128xf32> to vector<8x96xf32>
    %223 = arith.negf %222 : vector<8x96xf32>
    %224 = math.exp %223 : vector<8x96xf32>
    %cst_93 = arith.constant 1.000000e+00 : f32
    %225 = vector.broadcast %cst_93 : f32 to vector<8x96xf32>
    %226 = arith.addf %225, %224 : vector<8x96xf32>
    %227 = arith.divf %225, %226 : vector<8x96xf32>
    %228 = vector.extract_strided_slice %221 {offsets = [0, 96], sizes = [8, 32], strides = [1, 1]} : vector<8x128xf32> to vector<8x32xf32>
    %229 = math.tanh %228 : vector<8x32xf32>
    %230 = vector.extract_strided_slice %227 {offsets = [0, 32], sizes = [8, 32], strides = [1, 1]} : vector<8x96xf32> to vector<8x32xf32>
    %231 = arith.mulf %230, %202 : vector<8x32xf32>
    %232 = vector.extract_strided_slice %227 {offsets = [0, 0], sizes = [8, 32], strides = [1, 1]} : vector<8x96xf32> to vector<8x32xf32>
    %233 = arith.mulf %232, %229 : vector<8x32xf32>
    %234 = arith.addf %231, %233 : vector<8x32xf32>
    %235 = vector.extract_strided_slice %227 {offsets = [0, 64], sizes = [8, 32], strides = [1, 1]} : vector<8x96xf32> to vector<8x32xf32>
    %236 = math.tanh %234 : vector<8x32xf32>
    %237 = arith.mulf %235, %236 : vector<8x32xf32>
    %c0_94 = arith.constant 0 : index
    %238 = arith.index_cast %213 : i32 to index
    %c0_95 = arith.constant 0 : index
    %c0_96 = arith.constant 0 : index
    %239 = vector.load %arg6[%c0_94, %238, %c0_95, %c0_96] : memref<1x8x8x32xf32, #tpu.memory_space<vmem>>, vector<1x1x8x32xf32>
    %240 = vector.shape_cast %239 : vector<1x1x8x32xf32> to vector<8x32xf32>
    %241 = vector.shape_cast %237 : vector<8x32xf32> to vector<1x1x8x32xf32>
    tpu.vector_store %arg6[%c0_94, %238, %c0_95, %c0_96], %241 {strides = array<i32>} : memref<1x8x8x32xf32, #tpu.memory_space<vmem>>, vector<1x1x8x32xf32>,
    %c7_i32_97 = arith.constant 7 : i32
    %c2_i32_98 = arith.constant 2 : i32
    %242 = arith.muli %c2_i32_98, %c7_i32_97 : i32
    %c7_i32_99 = arith.constant 7 : i32
    %243 = arith.subi %c7_i32_99, %242 : i32
    %244 = arith.muli %arg0, %243 : i32
    %245 = arith.addi %c7_i32_97, %244 : i32
    %c8_i32_100 = arith.constant 8 : i32
    %246 = arith.muli %245, %c8_i32_100 : i32
    %247 = tpu.assume_multiple %246, 8 : i32
    %c0_101 = arith.constant 0 : index
    %c0_102 = arith.constant 0 : index
    %c0_103 = arith.constant 0 : index
    %248 = vector.load %arg4[%c0_101, %c0_102, %c0_103] : memref<1x32x128xf32, #tpu.memory_space<vmem>>, vector<1x32x128xf32>
    %249 = vector.shape_cast %248 : vector<1x32x128xf32> to vector<32x128xf32>
    %cst_104 = arith.constant dense<0.000000e+00> : vector<8x128xf32>
    %250 = tpu.matmul %237, %249, %cst_104 {dimension_numbers = #tpu.dot_dimension_numbers<[1], [0], [0], [1], [0, 0, 1, 1], [], []>} : vector<8x32xf32>, vector<32x128xf32>, vector<8x128xf32> -> vector<8x128xf32>
    %251 = arith.index_cast %247 : i32 to index
    %c0_105 = arith.constant 0 : index
    %252 = vector.load %arg7[%251, %c0_105] : memref<64x128xf32, #tpu.memory_space<vmem>>, vector<8x128xf32>
    %253 = arith.addf %250, %252 : vector<8x128xf32>
    %254 = vector.extract_strided_slice %253 {offsets = [0, 0], sizes = [8, 96], strides = [1, 1]} : vector<8x128xf32> to vector<8x96xf32>
    %255 = arith.negf %254 : vector<8x96xf32>
    %256 = math.exp %255 : vector<8x96xf32>
    %cst_106 = arith.constant 1.000000e+00 : f32
    %257 = vector.broadcast %cst_106 : f32 to vector<8x96xf32>
    %258 = arith.addf %257, %256 : vector<8x96xf32>
    %259 = arith.divf %257, %258 : vector<8x96xf32>
    %260 = vector.extract_strided_slice %253 {offsets = [0, 96], sizes = [8, 32], strides = [1, 1]} : vector<8x128xf32> to vector<8x32xf32>
    %261 = math.tanh %260 : vector<8x32xf32>
    %262 = vector.extract_strided_slice %259 {offsets = [0, 32], sizes = [8, 32], strides = [1, 1]} : vector<8x96xf32> to vector<8x32xf32>
    %263 = arith.mulf %262, %234 : vector<8x32xf32>
    %264 = vector.extract_strided_slice %259 {offsets = [0, 0], sizes = [8, 32], strides = [1, 1]} : vector<8x96xf32> to vector<8x32xf32>
    %265 = arith.mulf %264, %261 : vector<8x32xf32>
    %266 = arith.addf %263, %265 : vector<8x32xf32>
    %267 = vector.extract_strided_slice %259 {offsets = [0, 64], sizes = [8, 32], strides = [1, 1]} : vector<8x96xf32> to vector<8x32xf32>
    %268 = math.tanh %266 : vector<8x32xf32>
    %269 = arith.mulf %267, %268 : vector<8x32xf32>
    %c0_107 = arith.constant 0 : index
    %270 = arith.index_cast %245 : i32 to index
    %c0_108 = arith.constant 0 : index
    %c0_109 = arith.constant 0 : index
    %271 = vector.load %arg6[%c0_107, %270, %c0_108, %c0_109] : memref<1x8x8x32xf32, #tpu.memory_space<vmem>>, vector<1x1x8x32xf32>
    %272 = vector.shape_cast %271 : vector<1x1x8x32xf32> to vector<8x32xf32>
    %273 = vector.shape_cast %269 : vector<8x32xf32> to vector<1x1x8x32xf32>
    tpu.vector_store %arg6[%c0_107, %270, %c0_108, %c0_109], %273 {strides = array<i32>} : memref<1x8x8x32xf32, #tpu.memory_space<vmem>>, vector<1x1x8x32xf32>,
    %c8_i32_110 = arith.constant 8 : i32
    %274 = arith.index_cast %arg0 : i32 to index
    %c0_111 = arith.constant 0 : index
    %c0_112 = arith.constant 0 : index
    %275 = vector.load %arg8[%274, %c0_111, %c0_112] : memref<2x8x32xf32, #tpu.memory_space<vmem>>, vector<1x8x32xf32>
    %276 = vector.shape_cast %275 : vector<1x8x32xf32> to vector<8x32xf32>
    %277 = vector.shape_cast %269 : vector<8x32xf32> to vector<1x8x32xf32>
    tpu.vector_store %arg8[%274, %c0_111, %c0_112], %277 {strides = array<i32>} : memref<2x8x32xf32, #tpu.memory_space<vmem>>, vector<1x8x32xf32>,
    %278 = arith.index_cast %arg0 : i32 to index
    %c0_113 = arith.constant 0 : index
    %c0_114 = arith.constant 0 : index
    %279 = vector.load %arg9[%278, %c0_113, %c0_114] : memref<2x8x32xf32, #tpu.memory_space<vmem>>, vector<1x8x32xf32>
    %280 = vector.shape_cast %279 : vector<1x8x32xf32> to vector<8x32xf32>
    %281 = vector.shape_cast %266 : vector<8x32xf32> to vector<1x8x32xf32>
    tpu.vector_store %arg9[%278, %c0_113, %c0_114], %281 {strides = array<i32>} : memref<2x8x32xf32, #tpu.memory_space<vmem>>, vector<1x8x32xf32>,
    return
  }
  func.func @transform_0(%arg0: i32, %arg1: i32) -> (i32, i32) {
    %c2_i32 = arith.constant 2 : i32
    %0 = arith.muli %c2_i32, %arg1 : i32
    %c0_i32 = arith.constant 0 : i32
    %1 = arith.subi %c0_i32, %0 : i32
    %2 = arith.muli %arg0, %1 : i32
    %3 = arith.addi %arg1, %2 : i32
    %c0_i32_0 = arith.constant 0 : i32
    %c0_i32_1 = arith.constant 0 : i32
    return %3, %c0_i32_0 : i32, i32
  }
  func.func @transform_1(%arg0: i32, %arg1: i32) -> (i32, i32, i32) {
    %c0_i32 = arith.constant 0 : i32
    %c0_i32_0 = arith.constant 0 : i32
    %c0_i32_1 = arith.constant 0 : i32
    return %arg0, %c0_i32, %c0_i32_0 : i32, i32, i32
  }
  func.func @transform_2(%arg0: i32, %arg1: i32) -> (i32, i32, i32) {
    %c0_i32 = arith.constant 0 : i32
    %c0_i32_0 = arith.constant 0 : i32
    %c0_i32_1 = arith.constant 0 : i32
    return %arg0, %c0_i32, %c0_i32_0 : i32, i32, i32
  }
  func.func @transform_3(%arg0: i32, %arg1: i32) -> (i32, i32, i32) {
    %c0_i32 = arith.constant 0 : i32
    %c0_i32_0 = arith.constant 0 : i32
    %c0_i32_1 = arith.constant 0 : i32
    return %arg0, %c0_i32, %c0_i32_0 : i32, i32, i32
  }
  func.func @transform_4(%arg0: i32, %arg1: i32) -> (i32, i32, i32, i32) {
    %c2_i32 = arith.constant 2 : i32
    %0 = arith.muli %c2_i32, %arg1 : i32
    %c0_i32 = arith.constant 0 : i32
    %1 = arith.subi %c0_i32, %0 : i32
    %2 = arith.muli %arg0, %1 : i32
    %3 = arith.addi %arg1, %2 : i32
    %c0_i32_0 = arith.constant 0 : i32
    %c0_i32_1 = arith.constant 0 : i32
    %c0_i32_2 = arith.constant 0 : i32
    return %arg0, %3, %c0_i32_0, %c0_i32_1 : i32, i32, i32, i32
  }
}

module attributes {stable_mosaic.version = 11 : i64} {
  func.func @_linear_kernel(%arg0: i32, %arg1: memref<2x64x32xf32, #tpu.memory_space<vmem>>, %arg2: memref<32x128xf32, #tpu.memory_space<vmem>>, %arg3: memref<32x128xf32, #tpu.memory_space<vmem>>, %arg4: memref<1x128xf32, #tpu.memory_space<vmem>>, %arg5: memref<64x128xf32, #tpu.memory_space<vmem>>) attributes {dimension_semantics = [#tpu.dimension_semantics<parallel>], iteration_bounds = array<i64: 1>, scalar_prefetch = 0 : i64, scratch_operands = 0 : i64, tpu.core_type = #tpu.core_type<tc>, window_params = [{transform_indices = @transform_0, window_bounds = array<i64: 2, 64, 32>}, {pipeline_mode = #tpu.pipeline_mode<synchronous>, transform_indices = @transform_1, window_bounds = array<i64: 32, 128>}, {pipeline_mode = #tpu.pipeline_mode<synchronous>, transform_indices = @transform_2, window_bounds = array<i64: 32, 128>}, {pipeline_mode = #tpu.pipeline_mode<synchronous>, transform_indices = @transform_3, window_bounds = array<i64: 1, 128>}, {transform_indices = @transform_4, window_bounds = array<i64: 64, 128>}]} {
    %c0 = arith.constant 0 : index
    %c0_0 = arith.constant 0 : index
    %c0_1 = arith.constant 0 : index
    %0 = vector.load %arg1[%c0, %c0_0, %c0_1] : memref<2x64x32xf32, #tpu.memory_space<vmem>>, vector<1x64x32xf32>
    %1 = vector.shape_cast %0 : vector<1x64x32xf32> to vector<64x32xf32>
    %c0_2 = arith.constant 0 : index
    %c0_3 = arith.constant 0 : index
    %2 = vector.load %arg2[%c0_2, %c0_3] : memref<32x128xf32, #tpu.memory_space<vmem>>, vector<32x128xf32>
    %cst = arith.constant dense<0.000000e+00> : vector<64x128xf32>
    %3 = tpu.matmul %1, %2, %cst {dimension_numbers = #tpu.dot_dimension_numbers<[1], [0], [0], [1], [0, 0, 1, 1], [], []>} : vector<64x32xf32>, vector<32x128xf32>, vector<64x128xf32> -> vector<64x128xf32>
    %c1 = arith.constant 1 : index
    %c0_4 = arith.constant 0 : index
    %c0_5 = arith.constant 0 : index
    %4 = vector.load %arg1[%c1, %c0_4, %c0_5] : memref<2x64x32xf32, #tpu.memory_space<vmem>>, vector<1x64x32xf32>
    %5 = vector.shape_cast %4 : vector<1x64x32xf32> to vector<64x32xf32>
    %c0_6 = arith.constant 0 : index
    %c0_7 = arith.constant 0 : index
    %6 = vector.load %arg3[%c0_6, %c0_7] : memref<32x128xf32, #tpu.memory_space<vmem>>, vector<32x128xf32>
    %cst_8 = arith.constant dense<0.000000e+00> : vector<64x128xf32>
    %7 = tpu.matmul %5, %6, %cst_8 {dimension_numbers = #tpu.dot_dimension_numbers<[1], [0], [0], [1], [0, 0, 1, 1], [], []>} : vector<64x32xf32>, vector<32x128xf32>, vector<64x128xf32> -> vector<64x128xf32>
    %8 = arith.addf %3, %7 : vector<64x128xf32>
    %c0_9 = arith.constant 0 : index
    %c0_10 = arith.constant 0 : index
    %9 = vector.load %arg4[%c0_9, %c0_10] : memref<1x128xf32, #tpu.memory_space<vmem>>, vector<1x128xf32>
    %10 = vector.broadcast %9 : vector<1x128xf32> to vector<64x128xf32>
    %11 = arith.addf %8, %10 : vector<64x128xf32>
    %c0_11 = arith.constant 0 : index
    %c0_12 = arith.constant 0 : index
    %12 = vector.load %arg5[%c0_11, %c0_12] : memref<64x128xf32, #tpu.memory_space<vmem>>, vector<64x128xf32>
    tpu.vector_store %arg5[%c0_11, %c0_12], %11 {strides = array<i32>} : memref<64x128xf32, #tpu.memory_space<vmem>>, vector<64x128xf32>,
    return
  }
  func.func @transform_0(%arg0: i32) -> (i32, i32, i32) {
    %c0_i32 = arith.constant 0 : i32
    %c0_i32_0 = arith.constant 0 : i32
    %c0_i32_1 = arith.constant 0 : i32
    return %c0_i32, %arg0, %c0_i32_0 : i32, i32, i32
  }
  func.func @transform_1(%arg0: i32) -> (i32, i32) {
    %c0_i32 = arith.constant 0 : i32
    %c0_i32_0 = arith.constant 0 : i32
    %c0_i32_1 = arith.constant 0 : i32
    return %c0_i32, %c0_i32_0 : i32, i32
  }
  func.func @transform_2(%arg0: i32) -> (i32, i32) {
    %c0_i32 = arith.constant 0 : i32
    %c0_i32_0 = arith.constant 0 : i32
    %c0_i32_1 = arith.constant 0 : i32
    return %c0_i32, %c0_i32_0 : i32, i32
  }
  func.func @transform_3(%arg0: i32) -> (i32, i32) {
    %c0_i32 = arith.constant 0 : i32
    %c0_i32_0 = arith.constant 0 : i32
    %c0_i32_1 = arith.constant 0 : i32
    return %c0_i32, %c0_i32_0 : i32, i32
  }
  func.func @transform_4(%arg0: i32) -> (i32, i32) {
    %c0_i32 = arith.constant 0 : i32
    %c0_i32_0 = arith.constant 0 : i32
    return %arg0, %c0_i32 : i32, i32
  }
}

</mosaic_0001>

<bundles_post_ra>
// kernel: bidirectional_lstm_forward.3
= control target key start
LH: loop header
LB: loop body
LE: loop exit
PB: predicated region body
PF: predicated region fallthrough
CT: control target
= control target key end

     0   :  { %vm42_vm0 = vcmask 261120   ;;  %s370_s2 = inlined_call_operand.vmem [shape: f32[32,128], index: 2, kind: input, shape index: {}]   ;;  %s371_s1 = inlined_call_operand.vmem [shape: f32[32,128], index: 1, kind: input, shape index: {}]   ;;  %s372_s0 = inlined_call_operand.vmem [shape: f32[2,64,32], index: 0, kind: input, shape index: {}]   ;;  %s373_s3 = inlined_call_operand.vmem [shape: f32[1,128], index: 3, kind: input, shape index: {}]   ;;  %s374_s4 = inlined_call_operand.vmem [shape: f32[64,128], index: 4, kind: output, shape index: {}]  }
   0x1   :  { %v41_v0 = vld [vmem:[%s370_s2 + $0x18] sm:$0xff]  ;;  %v40_v2 = vld [vmem:[%s370_s2 + $0x10] sm:$0xff]  ;;  %v39_v4 = vld [vmem:[%s370_s2 + $0x8] sm:$0xff] }
   0x2   :  { %v28_v1 = vld [vmem:[%s371_s1 + $0x18] sm:$0xff]  ;;  %221 = vmatpush.msra.mxu2 %v41_v0  ;;  %v27_v3 = vld [vmem:[%s371_s1 + $0x10] sm:$0xff]  ;;  %v26_v5 = vld [vmem:[%s371_s1 + $0x8] sm:$0xff]  ;;  %79 = vmatpush.msra.mxu0 %v41_v0 }
   0x3   :  { %225 = vmatpush.msra.mxu3 %v28_v1  ;;  %144 = vmatpush.msra.mxu1 %v28_v1  ;;  %v38_v6 = vld [vmem:[%s370_s2] sm:$0xff]  ;;  %v202_v12 = vld [vmem:[%s372_s0 + $0x68] sm:$0xff]  ;;  %v203_v16 = vld [vmem:[%s372_s0 + $0x70] sm:$0xff] }
   0x4   :  { %222 = vmatpush.msra.mxu2 %v40_v2  ;;  %v25_v7 = vld [vmem:[%s371_s1] sm:$0xff]  ;;  %80 = vmatpush.msra.mxu0 %v40_v2  ;;  %v22_v13 = vld [vmem:[%s372_s0 + $0x28] sm:$0xff]  ;;  %v23_v17 = vld [vmem:[%s372_s0 + $0x30] sm:$0xff] }
   0x5   :  { %226 = vmatpush.msra.mxu3 %v27_v3  ;;  %145 = vmatpush.msra.mxu1 %v27_v3  ;;  %v201_v8 = vld [vmem:[%s372_s0 + $0x60] sm:$0xff]  ;;  %v198_v14 = vld [vmem:[%s372_s0 + $0x48] sm:$0xff]  ;;  %v199_v18 = vld [vmem:[%s372_s0 + $0x50] sm:$0xff] }
   0x6   :  { %223 = vmatpush.msra.mxu2 %v39_v4  ;;  %v21_v9 = vld [vmem:[%s372_s0 + $0x20] sm:$0xff]  ;;  %81 = vmatpush.msra.mxu0 %v39_v4  ;;  %v18_v15 = vld [vmem:[%s372_s0 + $0x8] sm:$0xff]  ;;  %v19_v19 = vld [vmem:[%s372_s0 + $0x10] sm:$0xff] }
   0x7   :  { %227 = vmatpush.msra.mxu3 %v26_v5  ;;  %146 = vmatpush.msra.mxu1 %v26_v5  ;;  %v197_v10 = vld [vmem:[%s372_s0 + $0x40] sm:$0xff]  ;;  %v204_v20 = vld [vmem:[%s372_s0 + $0x78] sm:$0xff] }
   0x8   :  { %224 = vmatpush.msra.mxu2 %v38_v6  ;;  %v17_v11 = vld [vmem:[%s372_s0] sm:$0xff]  ;;  %82 = vmatpush.msra.mxu0 %v38_v6  ;;  %v24_v21 = vld [vmem:[%s372_s0 + $0x38] sm:$0xff] }
   0x9   :  { %228 = vmatpush.msra.mxu3 %v25_v7  ;;  %209 = vmatmul.msk.f32.vlgmr.msra.gmra.mxu2 %vm42_vm0, %v201_v8  ;;  %v200_v22 = vld [vmem:[%s372_s0 + $0x58] sm:$0xff]  ;;  %v229_v24 = vld [vmem:[%s373_s3] ss:$0 sm:$0xff] }
   0xa   :  { %217 = vmatmul.msk.f32.vlgmr.msra.gmra.mxu3 %vm42_vm0, %v21_v9  ;;  %147 = vmatpush.msra.mxu1 %v25_v7  ;;  %v20_v23 = vld [vmem:[%s372_s0 + $0x18] sm:$0xff] }
   0xb   :  { %205 = vmatmul.msk.f32.vlgmr.msra.gmra.mxu0 %vm42_vm0, %v197_v10  ;;  %213 = vmatmul.msk.f32.vlgmr.msra.gmra.mxu1 %vm42_vm0, %v17_v11 }
  0x11   :  { %210 = vmatmul.msk.f32.gmra.mxu2 %vm42_vm0, %v202_v12 }
  0x12   :  { %218 = vmatmul.msk.f32.gmra.mxu3 %vm42_vm0, %v22_v13 }
  0x13   :  { %206 = vmatmul.msk.f32.gmra.mxu0 %vm42_vm0, %v198_v14  ;;  %214 = vmatmul.msk.f32.gmra.mxu1 %vm42_vm0, %v18_v15 }
  0x19   :  { %211 = vmatmul.msk.f32.gmra.mxu2 %vm42_vm0, %v203_v16 }
  0x1a   :  { %219 = vmatmul.msk.f32.gmra.mxu3 %vm42_vm0, %v23_v17 }
  0x1b   :  { %207 = vmatmul.msk.f32.gmra.mxu0 %vm42_vm0, %v199_v18  ;;  %215 = vmatmul.msk.f32.gmra.mxu1 %vm42_vm0, %v19_v19 }
  0x21   :  { %212 = vmatmul.msk.f32.gmra.mxu2 %vm42_vm0, %v204_v20 }
  0x22   :  { %220 = vmatmul.msk.f32.gmra.mxu3 %vm42_vm0, %v24_v21 }
  0x23   :  { %208 = vmatmul.msk.f32.gmra.mxu0 %vm42_vm0, %v200_v22  ;;  %216 = vmatmul.msk.f32.gmra.mxu1 %vm42_vm0, %v20_v23 }
  0x88   :  { %v84_v25 = vpop.f32.mrf.mxu0  ;;  %v149_v26 = vpop.f32.mrf.mxu1 }
  0x89   :  { %v150_v27 = vadd.f32 %v149_v26, %v84_v25 }
  0x8b   :  { %v177_v28 = vadd.f32 %v229_v24, %v150_v27 }
  0x8c   :  { %v96_v29 = vpop.f32.mrf.mxu2 }
  0x8d   :  { %v161_v30 = vpop.f32.mrf.mxu3  ;;  %185 = vst [vmem:[%s374_s4] sm:$0xff] %v177_v28 }
  0x8e   :  { %v162_v31 = vadd.f32 %v161_v30, %v96_v29 }
  0x90   :  { %v181_v32 = vadd.f32 %v229_v24, %v162_v31  ;;  %v87_v33 = vpop.f32.mrf.mxu0  ;;  %v152_v34 = vpop.f32.mrf.mxu1 }
  0x91   :  { %v153_v35 = vadd.f32 %v152_v34, %v87_v33 }
  0x92   :  { %189 = vst [vmem:[%s374_s4 + $0x20] sm:$0xff] %v181_v32 }
  0x93   :  { %v178_v36 = vadd.f32 %v229_v24, %v153_v35 }
  0x94   :  { %v99_v37 = vpop.f32.mrf.mxu2 }
  0x95   :  { %v164_v38 = vpop.f32.mrf.mxu3  ;;  %186 = vst [vmem:[%s374_s4 + $0x8] sm:$0xff] %v178_v36 }
  0x96   :  { %v165_v39 = vadd.f32 %v164_v38, %v99_v37 }
  0x98   :  { %v182_v40 = vadd.f32 %v229_v24, %v165_v39  ;;  %v90_v41 = vpop.f32.mrf.mxu0  ;;  %v155_v42 = vpop.f32.mrf.mxu1 }
  0x99   :  { %v156_v43 = vadd.f32 %v155_v42, %v90_v41 }
  0x9a   :  { %190 = vst [vmem:[%s374_s4 + $0x28] sm:$0xff] %v182_v40 }
  0x9b   :  { %v179_v44 = vadd.f32 %v229_v24, %v156_v43 }
  0x9c   :  { %v102_v45 = vpop.f32.mrf.mxu2 }
  0x9d   :  { %v167_v46 = vpop.f32.mrf.mxu3  ;;  %187 = vst [vmem:[%s374_s4 + $0x10] sm:$0xff] %v179_v44 }
  0x9e   :  { %v168_v47 = vadd.f32 %v167_v46, %v102_v45 }
  0xa0   :  { %v183_v48 = vadd.f32 %v229_v24, %v168_v47  ;;  %v93_v49 = vpop.f32.mrf.mxu0  ;;  %v158_v50 = vpop.f32.mrf.mxu1 }
  0xa1   :  { %v159_v51 = vadd.f32 %v158_v50, %v93_v49 }
  0xa2   :  { %191 = vst [vmem:[%s374_s4 + $0x30] sm:$0xff] %v183_v48 }
  0xa3   :  { %v180_v52 = vadd.f32 %v229_v24, %v159_v51 }
  0xa4   :  { %v105_v53 = vpop.f32.mrf.mxu2 }
  0xa5   :  { %v170_v54 = vpop.f32.mrf.mxu3  ;;  %188 = vst [vmem:[%s374_s4 + $0x18] sm:$0xff] %v180_v52 }
  0xa6   :  { %v171_v55 = vadd.f32 %v170_v54, %v105_v53 }
  0xa8   :  { %v184_v56 = vadd.f32 %v229_v24, %v171_v55 }
  0xaa   :  { %192 = vst [vmem:[%s374_s4 + $0x38] sm:$0xff] %v184_v56 }

// kernel: bidirectional_lstm_forward.2
= control target key start
LH: loop header
LB: loop body
LE: loop exit
PB: predicated region body
PF: predicated region fallthrough
CT: control target
= control target key end

     0   :  { %s1435_s15 = smov 0   ;;  %s1437_s16 = smov 0   ;;  %s1676_s0 = inlined_call_operand.vmem [shape: f32[64,16], index: 0, kind: input, shape index: {}]   ;;  %s1677_s1 = inlined_call_operand.vmem [shape: f32[2,16,128], index: 1, kind: input, shape index: {}]   ;;  %s1678_s2 = inlined_call_operand.vmem [shape: f32[2,32,128], index: 2, kind: input, shape index: {}]   ;;  %s1679_s3 = inlined_call_operand.vmem [shape: f32[2,1,128], index: 3, kind: input, shape index: {}]   ;;  %s1680_s4 = inlined_call_operand.vmem [shape: f32[2,8,8,32], index: 4, kind: output, shape index: {}]  }
   0x1   :  { %s1439_s17 = smov 0  }
   0x2 LB: > { %s26_s18 = sadd.s32 1, %s1400_s16  ;;  %p1223_p0 = scmp.ge.s32.totalorder %s1404_s17, 1  ;;  %s1404_s17 = sphi %s1439_s17, %s14_s17   ;;  %s1400_s16 = sphi %s1437_s16, %s1682_s16   ;;  %s1396_s15 = sphi %s1435_s15, %s1681_s15  }
   0x3   : > { %p28_p1 = scmp.ge.s32.totalorder %s26_s18, 2  ;;  %p229_p2 = scmp.lt.s32.totalorder %s1404_s17, 3 }
   0x5   : > { %s1684_s18 = smov (%p28_p1, %s26_s18), 0  ;;  %p230_p3 = pnand %p1223_p0, %p229_p2 }
   0x6   : > { %p294_p4 = scmp.lt.s32.totalorder (!%p230_p3), %s1396_s15, 1  ;;  %s1465_s25 = sshll.u32 (!%p230_p3), %s1396_s15, 3 }
   0x7   : > { %233 = sbr.rel (%p230_p3) target bundleno = 4694 (0x1256), region = 36  ;;  %s1488_s10 = scalar_lea.vmem (!%p230_p3), [#allocation3], %s1465_s25 }
   0x8   : > { %s1550_s30 = scalar_lea.vmem (!%p230_p3), [#allocation4], %s1465_s25  ;;  %s1407_s8 = smov (!%p230_p3), 32  }
   0x9   : > { %s1408_s9 = smov (!%p230_p3), 64   ;;  %s1249_s23 = smul.u32 (!%p230_p3), 24, %s1396_s15 }
   0xa   : > { %s1130_s27 = scalar_lea.vmem (!%p230_p3), [#allocation2], %s1465_s25  ;;  %s1270_s13 = smul.u32 (!%p230_p3), 4294967256, %s1396_s15 }
   0xc   : > { %s1457_s19 = scalar_select %p294_p4, %s1396_s15, 1  ;;  %v335_v2 = vld [vmem:[%s1676_s0] sm:$0xff]  ;;  %vm349_vm0 = vcmask 130048   ;;  %v340_v3 = vld [vmem:[%s1676_s0 + $0x28] sm:$0xff]  ;;  %vm331_vm1 = vcmask 261120   ;;  %v1406_v6 = vmov 0.0  }
   0xd   : > { %332 = vst.msk [vmem:[%s1488_s10] sm:$0xff] %vm331_vm1, %v1406_v6  ;;  %v336_v9 = vld [vmem:[%s1676_s0 + $0x8] sm:$0xff]  ;;  %v341_v10 = vld [vmem:[%s1676_s0 + $0x30] sm:$0xff]  ;;  %v342_v13 = vld [vmem:[%s1676_s0 + $0x38] sm:$0xff] }
   0xe   : > { %s1284_s20 = sshll.u32 %s1457_s19, 4  ;;  %s1285_s21 = sshll.u32 %s1457_s19, 5  ;;  %v337_v12 = vld [vmem:[%s1676_s0 + $0x10] sm:$0xff]  ;;  %v338_v14 = vld [vmem:[%s1676_s0 + $0x18] sm:$0xff]  ;;  %v339_v15 = vld [vmem:[%s1676_s0 + $0x20] sm:$0xff]  ;;  %334 = vst.msk [vmem:[%s1550_s30] sm:$0xff] %vm331_vm1, %v1406_v6 }
   0xf   : > { %s298_s24 = scalar_lea.vmem %s1677_s1, %s1284_s20  ;;  %s306_s28 = scalar_lea.vmem %s1679_s3, %s1457_s19 }
  0x10   : > { %v344_v0 = vld [vmem:[%s298_s24 + $0x8] sm:$0xff]  ;;  %v343_v1 = vld [vmem:[%s298_s24] sm:$0xff]  ;;  %s303_s5 = scalar_lea.vmem %s1678_s2, %s1285_s21  ;;  %s1286_s11 = sshll.u32 %s1457_s19, 6 }
  0x11   : > { %388 = vmatpush.msra.mxu0 %v344_v0  ;;  %1287 = vmatpush.msra.mxu3 %v344_v0  ;;  %v1482_v4 = vld [vmem:[%s303_s5 + $0x18] sm:$0xff]  ;;  %v1484_v5 = vld [vmem:[%s303_s5 + $0x10] sm:$0xff]  ;;  %v1493_v7 = vld [vmem:[%s303_s5 + $0x8] sm:$0xff]  ;;  %s1572_s14 = scalar_lea.vmem %s1680_s4, %s1286_s11  ;;  %s1243_s19 = smul.u32 40, %s1396_s15 }
  0x12   : > { %452 = vmatpush.msra.mxu1 %v1482_v4  ;;  %531 = vmatpush.msra.mxu2 %v1482_v4  ;;  %v1498_v8 = vld [vmem:[%s303_s5] sm:$0xff]  ;;  %s1123_s24 = scalar_lea.vmem [#allocation2], %s1249_s23  ;;  %s1127_s26 = scalar_lea.vmem %s1572_s14, %s1249_s23 }
  0x13   : > { %389 = vmatpush.msra.mxu0 %v343_v1  ;;  %1288 = vmatpush.msra.mxu3 %v343_v1  ;;  %v1317_v16 = vld [vmem:[%s306_s28] ss:$0 sm:$0xff]  ;;  %s429_s28 = smul.u32 56, %s1396_s15  ;;  %s1115_s21 = scalar_lea.vmem [#allocation2], %s1243_s19 }
  0x14   : > { %1231 = vmatmul.msk.f32.vlgmr.msra.gmra.mxu0 %vm349_vm0, %v335_v2  ;;  %1236 = vmatmul.msk.f32.vlgmr.msra.gmra.mxu3 %vm349_vm0, %v340_v3  ;;  %v425_v11 = vld [vmem:[%s1488_s10] sm:$0xff]  ;;  %s1119_s22 = scalar_lea.vmem %s1572_s14, %s1243_s19  ;;  %s1133_s29 = scalar_lea.vmem %s1572_s14, %s1465_s25 }
  0x15   : > { %605 = vmatpush.msrb.mxu3 %v1482_v4  ;;  %453 = vmatpush.msra.mxu1 %v1484_v5  ;;  %s434_s7 = scalar_lea.vmem [#allocation2], %s429_s28  ;;  %v427_v37 = vld [vmem:[%s1550_s30] sm:$0xff]  ;;  %s506_s20 = scalar_lea.vmem %s1572_s14, %s429_s28 }
  0x16   : > { %532 = vmatpush.msra.mxu2 %v1484_v5  ;;  %s729_s5 = ssub.s32 4, %s1396_s15  ;;  %s1153_s19 = scalar_lea.vmem %s1572_s14, %s1270_s13 }
  0x17   : > { %606 = vmatpush.msrb.mxu3 %v1484_v5  ;;  %454 = vmatpush.msra.mxu1 %v1493_v7  ;;  %s1617_s6 = sshll.u32 %s729_s5, 3  ;;  %s1409_s23 = smov 96  }
  0x18   : > { %533 = vmatpush.msra.mxu2 %v1493_v7  ;;  %s735_s28 = scalar_lea.vmem [#allocation2], %s1617_s6  ;;  %s800_s25 = scalar_lea.vmem %s1572_s14, %s1617_s6 }
  0x19   : > { %607 = vmatpush.msrb.mxu3 %v1493_v7  ;;  %455 = vmatpush.msra.mxu1 %v1498_v8 }
  0x1a   : > { %534 = vmatpush.msra.mxu2 %v1498_v8  ;;  %1240 = vmatmul.msk.f32.vlgmr.msra.gmra.mxu1 %vm331_vm1, %v425_v11 }
  0x1b   : > { %608 = vmatpush.msrb.mxu3 %v1498_v8  ;;  %678 = vmatpush.msrb.mxu1 %v1482_v4 }
  0x1c   : > { %1232 = vmatmul.msk.f32.gmra.mxu0 %vm349_vm0, %v336_v9  ;;  %1237 = vmatmul.msk.f32.gmra.mxu3 %vm349_vm0, %v341_v10 }
  0x1d   : > { %751 = vmatpush.msrb.mxu2 %v1482_v4  ;;  %825 = vmatpush.msra.mxu3 %v1482_v4 }
  0x1e   : > { %679 = vmatpush.msrb.mxu1 %v1484_v5 }
  0x1f   : > { %752 = vmatpush.msrb.mxu2 %v1484_v5  ;;  %826 = vmatpush.msra.mxu3 %v1484_v5 }
  0x20   : > { %680 = vmatpush.msrb.mxu1 %v1493_v7 }
  0x21   : > { %753 = vmatpush.msrb.mxu2 %v1493_v7  ;;  %827 = vmatpush.msra.mxu3 %v1493_v7 }
  0x22   : > { %681 = vmatpush.msrb.mxu1 %v1498_v8 }
  0x23   : > { %754 = vmatpush.msrb.mxu2 %v1498_v8  ;;  %828 = vmatpush.msra.mxu3 %v1498_v8 }
  0x24   : > { %1233 = vmatmul.msk.f32.gmra.mxu0 %vm349_vm0, %v337_v12  ;;  %1238 = vmatmul.msk.f32.gmra.mxu3 %vm349_vm0, %v342_v13 }
  0x25   : > { %899 = vmatpush.msra.mxu1 %v1482_v4 }
  0x27   : > { %900 = vmatpush.msra.mxu1 %v1484_v5 }
  0x29   : > { %901 = vmatpush.msra.mxu1 %v1493_v7 }
  0x2b   : > { %902 = vmatpush.msra.mxu1 %v1498_v8 }
  0x2c   : > { %1234 = vmatmul.msk.f32.gmra.mxu0 %vm349_vm0, %v338_v14 }
  0x34   : > { %1235 = vmatmul.msk.f32.gmra.mxu0 %vm349_vm0, %v339_v15 }
  0x91   : > { %v391_v17 = vpop.f32.mrf.mxu0 }
  0x92   : > { %v392_v18 = vadd.f32 %v1317_v16, %v391_v17 }
  0x94   : > { %415 = vst [vmem:[#allocation2] sm:$0xff] %v392_v18 }
  0x97   : > { %v406_v19 = vpop.f32.mrf.mxu3  ;;  %v457_v33 = vpop.f32.mrf.mxu1 }
  0x98   : > { %v407_v20 = vadd.f32 %v1317_v16, %v406_v19 }
  0x99   : > { %v394_v21 = vpop.f32.mrf.mxu0 }
  0x9a   : > { %v395_v22 = vadd.f32 %v1317_v16, %v394_v21  ;;  %420 = vst [vmem:[#allocation2 + $0x28] sm:$0xff] %v407_v20 }
  0x9c   : > { %416 = vst [vmem:[#allocation2 + $0x8] sm:$0xff] %v395_v22 }
  0x9f   : > { %v409_v23 = vpop.f32.mrf.mxu3 }
  0xa0   : > { %v410_v24 = vadd.f32 %v1317_v16, %v409_v23 }
  0xa1   : > { %v397_v25 = vpop.f32.mrf.mxu0 }
  0xa2   : > { %v398_v26 = vadd.f32 %v1317_v16, %v397_v25  ;;  %421 = vst [vmem:[#allocation2 + $0x30] sm:$0xff] %v410_v24 }
  0xa4   : > { %417 = vst [vmem:[#allocation2 + $0x10] sm:$0xff] %v398_v26 }
  0xa7   : > { %v412_v27 = vpop.f32.mrf.mxu3 }
  0xa8   : > { %v413_v28 = vadd.f32 %v1317_v16, %v412_v27 }
  0xa9   : > { %v400_v29 = vpop.f32.mrf.mxu0 }
  0xaa   : > { %v401_v30 = vadd.f32 %v1317_v16, %v400_v29  ;;  %422 = vst [vmem:[#allocation2 + $0x38] sm:$0xff] %v413_v28 }
  0xac   : > { %418 = vst [vmem:[#allocation2 + $0x18] sm:$0xff] %v401_v30 }
  0xb1   : > { %v403_v31 = vpop.f32.mrf.mxu0 }
  0xb2   : > { %v404_v32 = vadd.f32 %v1317_v16, %v403_v31 }
  0xb4   : > { %419 = vst [vmem:[#allocation2 + $0x20] sm:$0xff] %v404_v32 }
  0xbb   : > { %v435_v34 = vld [vmem:[%s434_s7] sm:$0xff]  ;;  %v1244_v61 = vld [vmem:[%s1115_s21 + $0x8] sm:$0xff]  ;;  %v1250_v23 = vld [vmem:[%s1123_s24 + $0x10] sm:$0xff]  ;;  %s1264_s7 = smul.u32 4294967272, %s1396_s15 }
  0xbc   : > { %v458_v35 = vadd.f32 %v457_v33, %v435_v34  ;;  %s1276_s21 = smul.u32 4294967240, %s1396_s15 }
  0xbd   : > { %s1141_s11 = scalar_lea.vmem [#allocation2], %s1264_s7  ;;  %s1145_s12 = scalar_lea.vmem %s1572_s14, %s1264_s7 }
  0xbe   : > { %1318 = vtanh.f32 %v458_v35  ;;  %v1241_v38 = vmul.f32 -1.442695, %v458_v35  ;;  %s1161_s24 = scalar_lea.vmem %s1572_s14, %s1276_s21 }
  0xc0   : > { %1320 = vpow2.f32 %v1241_v38 }
  0xc4   : > { %v1319_v36 = vpop.eup %1318 }
  0xc5   : > { %486 = vrot.lane.b32.xlu0 %v1319_v36, %s1407_s8 }
  0xc6   : > { %v1321_v39 = vpop.eup %1320 }
  0xc7   : > { %v463_v40 = vadd.f32 1.0, %v1321_v39 }
  0xc9   : > { %1322 = vrcp.f32 %v463_v40  ;;  %v475_v46 = vand.u32 2147483648, %v463_v40  ;;  %vm469_vm3 = vweird.f32 %v463_v40  ;;  %v473_v47 = vand.u32 2147483647, %v463_v40 }
  0xcb   : > { %v476_v49 = vor.u32 1.1754944e-38, %v475_v46  ;;  %vm474_vm5 = vcmp.eq.f32.partialorder %v473_v47, 8.507059e+37 }
  0xcd   : > { %481 = vrot.lane.b32.xlu0 %v427_v37, %s1407_s8 }
  0xcf   : > { %v1323_v41 = vpop.eup %1322 }
  0xd0   : > { %v465_v42 = vmul.f32 %v1323_v41, %v463_v40  ;;  %vm470_vm2 = vweird.f32 %v1323_v41 }
  0xd1   : > { %vm471_vm4 = vmor %vm469_vm3, %vm470_vm2 }
  0xd2   : > { %v466_v43 = vsub.f32 1.0, %v465_v42 }
  0xd4   : > { %v467_v44 = vmul.f32 %v1323_v41, %v466_v43 }
  0xd6   : > { %v468_v45 = vadd.f32 %v1323_v41, %v467_v44 }
  0xd8   : > { %v472_v48 = vsel %vm471_vm4, %v1323_v41, %v468_v45 }
  0xd9   : > { %v477_v51 = vsel %vm474_vm5, %v476_v49, %v472_v48  ;;  %v1256_v49 = vld [vmem:[%s1130_s27 + $0x18] sm:$0xff] }
 0x137   : > { %v487_v50 = vpop.permute.xlu0 %486 }
 0x138   : > { %v489_v52 = vmul.f32 %v487_v50, %v477_v51 }
 0x13a   : > { %491 = vrot.lane.b32.xlu1 %v489_v52, %s1407_s8 }
 0x13f   : > { %v482_v53 = vpop.permute.xlu0 %481 }
 0x140   : > { %v484_v54 = vmul.f32 %v482_v53, %v477_v51 }
 0x1ac   : > { %v492_v55 = vpop.permute.xlu1 %491 }
 0x1ad   : > { %v494_v56 = vadd.f32 %v492_v55, %v484_v54 }
 0x1af   : > { %1324 = vtanh.f32 %v494_v56 }
 0x1b5   : > { %v1325_v57 = vpop.eup %1324 }
 0x1b6   : > { %497 = vrot.lane.b32.xlu1 %v1325_v57, %s1407_s8 }
 0x228   : > { %v498_v58 = vpop.permute.xlu1 %497 }
 0x229   : > { %v500_v59 = vmul.f32 %v498_v58, %v477_v51 }
 0x22b   : > { %502 = vrot.lane.b32.xlu2 %v500_v59, %s1408_s9 }
 0x285   : > { %v503_v60 = vpop.permute.xlu2 %502 }
 0x286   : > { %507 = vst.msk [vmem:[%s506_s20] sm:$0xff] %vm331_vm1, %v503_v60  ;;  %1245 = vmatmul.msk.f32.vlgmr.msra.gmra.mxu2 %vm331_vm1, %v503_v60  ;;  %s1149_s20 = scalar_lea.vmem [#allocation2], %s1270_s13 }
 0x287   : > { %973 = vmatpush.msra.mxu2 %v1482_v4 }
 0x289   : > { %974 = vmatpush.msra.mxu2 %v1484_v5 }
 0x28b   : > { %975 = vmatpush.msra.mxu2 %v1493_v7 }
 0x28d   : > { %976 = vmatpush.msra.mxu2 %v1498_v8 }
 0x309   : > { %v536_v62 = vpop.f32.mrf.mxu2 }
 0x30a   : > { %v537_v63 = vadd.f32 %v1244_v61, %v536_v62 }
 0x30c   : > { %1326 = vtanh.f32 %v537_v63  ;;  %v1246_v1 = vmul.f32 -1.442695, %v537_v63 }
 0x30e   : > { %1328 = vpow2.f32 %v1246_v1 }
 0x312   : > { %v1327_v0 = vpop.eup %1326 }
 0x313   : > { %561 = vrot.lane.b32.xlu2 %v1327_v0, %s1407_s8 }
 0x314   : > { %v1329_v2 = vpop.eup %1328 }
 0x315   : > { %v542_v3 = vadd.f32 1.0, %v1329_v2 }
 0x317   : > { %1330 = vrcp.f32 %v542_v3  ;;  %v554_v9 = vand.u32 2147483648, %v542_v3  ;;  %vm548_vm7 = vweird.f32 %v542_v3  ;;  %v552_v10 = vand.u32 2147483647, %v542_v3 }
 0x319   : > { %v555_v12 = vor.u32 1.1754944e-38, %v554_v9  ;;  %vm553_vm9 = vcmp.eq.f32.partialorder %v552_v10, 8.507059e+37 }
 0x31d   : > { %v1331_v4 = vpop.eup %1330 }
 0x31e   : > { %v544_v5 = vmul.f32 %v1331_v4, %v542_v3  ;;  %vm549_vm6 = vweird.f32 %v1331_v4 }
 0x31f   : > { %vm550_vm8 = vmor %vm548_vm7, %vm549_vm6 }
 0x320   : > { %v545_v6 = vsub.f32 1.0, %v544_v5 }
 0x322   : > { %v546_v7 = vmul.f32 %v1331_v4, %v545_v6 }
 0x324   : > { %v547_v8 = vadd.f32 %v1331_v4, %v546_v7 }
 0x326   : > { %v551_v11 = vsel %vm550_vm8, %v1331_v4, %v547_v8 }
 0x327   : > { %v556_v14 = vsel %vm553_vm9, %v555_v12, %v551_v11  ;;  %v736_v11 = vld [vmem:[%s735_s28] sm:$0xff] }
 0x328   : > { %v559_v16 = vmul.f32 %v556_v14, %v494_v56 }
 0x36d   : > { %v562_v13 = vpop.permute.xlu2 %561 }
 0x36e   : > { %v564_v15 = vmul.f32 %v562_v13, %v556_v14 }
 0x370   : > { %566 = vrot.lane.b32.xlu0 %v564_v15, %s1407_s8 }
 0x3e2   : > { %v567_v17 = vpop.permute.xlu0 %566 }
 0x3e3   : > { %v569_v18 = vadd.f32 %v567_v17, %v559_v16 }
 0x3e5   : > { %1332 = vtanh.f32 %v569_v18 }
 0x3eb   : > { %v1333_v19 = vpop.eup %1332 }
 0x3ec   : > { %572 = vrot.lane.b32.xlu1 %v1333_v19, %s1407_s8 }
 0x45e   : > { %v573_v20 = vpop.permute.xlu1 %572 }
 0x45f   : > { %v575_v21 = vmul.f32 %v573_v20, %v556_v14 }
 0x461   : > { %577 = vrot.lane.b32.xlu2 %v575_v21, %s1408_s9 }
 0x4bb   : > { %v578_v22 = vpop.permute.xlu2 %577 }
 0x4bc   : > { %1248 = vst.msk [vmem:[%s1119_s22 + $0x8] sm:$0xff] %vm331_vm1, %v578_v22  ;;  %1251 = vmatmul.msk.f32.vlgmr.msrb.gmra.mxu3 %vm331_vm1, %v578_v22  ;;  %s1157_s22 = scalar_lea.vmem [#allocation2], %s1276_s21 }
 0x53f   : > { %v610_v24 = vpop.f32.mrf.mxu3 }
 0x540   : > { %v611_v25 = vadd.f32 %v1250_v23, %v610_v24 }
 0x542   : > { %1334 = vtanh.f32 %v611_v25  ;;  %v1252_v27 = vmul.f32 -1.442695, %v611_v25 }
 0x544   : > { %1336 = vpow2.f32 %v1252_v27 }
 0x548   : > { %v1335_v26 = vpop.eup %1334 }
 0x549   : > { %635 = vrot.lane.b32.xlu0 %v1335_v26, %s1407_s8 }
 0x54a   : > { %v1337_v28 = vpop.eup %1336 }
 0x54b   : > { %v616_v29 = vadd.f32 1.0, %v1337_v28 }
 0x54d   : > { %1338 = vrcp.f32 %v616_v29  ;;  %v628_v35 = vand.u32 2147483648, %v616_v29  ;;  %vm622_vm11 = vweird.f32 %v616_v29  ;;  %v626_v36 = vand.u32 2147483647, %v616_v29 }
 0x54f   : > { %v629_v38 = vor.u32 1.1754944e-38, %v628_v35  ;;  %vm627_vm13 = vcmp.eq.f32.partialorder %v626_v36, 8.507059e+37 }
 0x553   : > { %v1339_v30 = vpop.eup %1338 }
 0x554   : > { %v618_v31 = vmul.f32 %v1339_v30, %v616_v29  ;;  %vm623_vm10 = vweird.f32 %v1339_v30 }
 0x555   : > { %vm624_vm12 = vmor %vm622_vm11, %vm623_vm10 }
 0x556   : > { %v619_v32 = vsub.f32 1.0, %v618_v31 }
 0x558   : > { %v620_v33 = vmul.f32 %v1339_v30, %v619_v32 }
 0x55a   : > { %v621_v34 = vadd.f32 %v1339_v30, %v620_v33 }
 0x55c   : > { %v625_v37 = vsel %vm624_vm12, %v1339_v30, %v621_v34 }
 0x55d   : > { %v630_v40 = vsel %vm627_vm13, %v629_v38, %v625_v37  ;;  %v1265_v37 = vld [vmem:[%s1141_s11 + $0x28] sm:$0xff] }
 0x55e   : > { %v633_v42 = vmul.f32 %v630_v40, %v569_v18 }
 0x5bb   : > { %v636_v39 = vpop.permute.xlu0 %635 }
 0x5bc   : > { %v638_v41 = vmul.f32 %v636_v39, %v630_v40 }
 0x5be   : > { %640 = vrot.lane.b32.xlu1 %v638_v41, %s1407_s8 }
 0x630   : > { %v641_v43 = vpop.permute.xlu1 %640 }
 0x631   : > { %v643_v44 = vadd.f32 %v641_v43, %v633_v42 }
 0x633   : > { %1340 = vtanh.f32 %v643_v44 }
 0x639   : > { %v1341_v45 = vpop.eup %1340 }
 0x63a   : > { %646 = vrot.lane.b32.xlu2 %v1341_v45, %s1407_s8 }
 0x694   : > { %v647_v46 = vpop.permute.xlu2 %646 }
 0x695   : > { %v649_v47 = vmul.f32 %v647_v46, %v630_v40 }
 0x697   : > { %651 = vrot.lane.b32.xlu0 %v649_v47, %s1408_s9 }
 0x709   : > { %v652_v48 = vpop.permute.xlu0 %651 }
 0x70a   : > { %1254 = vst.msk [vmem:[%s1127_s26 + $0x10] sm:$0xff] %vm331_vm1, %v652_v48  ;;  %1257 = vmatmul.msk.f32.vlgmr.msrb.gmra.mxu1 %vm331_vm1, %v652_v48 }
 0x787   : > { %v683_v50 = vpop.f32.mrf.mxu1 }
 0x788   : > { %v684_v51 = vadd.f32 %v1256_v49, %v683_v50 }
 0x78a   : > { %1342 = vtanh.f32 %v684_v51  ;;  %v1258_v53 = vmul.f32 -1.442695, %v684_v51 }
 0x78c   : > { %1344 = vpow2.f32 %v1258_v53 }
 0x790   : > { %v1343_v52 = vpop.eup %1342 }
 0x791   : > { %708 = vrot.lane.b32.xlu1 %v1343_v52, %s1407_s8 }
 0x792   : > { %v1345_v54 = vpop.eup %1344 }
 0x793   : > { %v689_v55 = vadd.f32 1.0, %v1345_v54 }
 0x795   : > { %1346 = vrcp.f32 %v689_v55  ;;  %v701_v61 = vand.u32 2147483648, %v689_v55  ;;  %vm695_vm15 = vweird.f32 %v689_v55  ;;  %v699_v62 = vand.u32 2147483647, %v689_v55 }
 0x797   : > { %v702_v0 = vor.u32 1.1754944e-38, %v701_v61  ;;  %vm700_vm2 = vcmp.eq.f32.partialorder %v699_v62, 8.507059e+37 }
 0x79b   : > { %v1347_v56 = vpop.eup %1346 }
 0x79c   : > { %v691_v57 = vmul.f32 %v1347_v56, %v689_v55  ;;  %vm696_vm14 = vweird.f32 %v1347_v56 }
 0x79d   : > { %vm697_vm0 = vmor %vm695_vm15, %vm696_vm14 }
 0x79e   : > { %v692_v58 = vsub.f32 1.0, %v691_v57 }
 0x7a0   : > { %v693_v59 = vmul.f32 %v1347_v56, %v692_v58 }
 0x7a2   : > { %v694_v60 = vadd.f32 %v1347_v56, %v693_v59 }
 0x7a4   : > { %v698_v63 = vsel %vm697_vm0, %v1347_v56, %v694_v60 }
 0x7a5   : > { %v703_v2 = vsel %vm700_vm2, %v702_v0, %v698_v63  ;;  %v1271_v63 = vld [vmem:[%s1149_s20 + $0x30] sm:$0xff] }
 0x7a6   : > { %v706_v4 = vmul.f32 %v703_v2, %v643_v44 }
 0x803   : > { %v709_v1 = vpop.permute.xlu1 %708 }
 0x804   : > { %v711_v3 = vmul.f32 %v709_v1, %v703_v2 }
 0x806   : > { %713 = vrot.lane.b32.xlu2 %v711_v3, %s1407_s8 }
 0x860   : > { %v714_v5 = vpop.permute.xlu2 %713 }
 0x861   : > { %v716_v6 = vadd.f32 %v714_v5, %v706_v4 }
 0x863   : > { %1348 = vtanh.f32 %v716_v6 }
 0x869   : > { %v1349_v7 = vpop.eup %1348 }
 0x86a   : > { %719 = vrot.lane.b32.xlu0 %v1349_v7, %s1407_s8 }
 0x8dc   : > { %v720_v8 = vpop.permute.xlu0 %719 }
 0x8dd   : > { %v722_v9 = vmul.f32 %v720_v8, %v703_v2 }
 0x8df   : > { %724 = vrot.lane.b32.xlu1 %v722_v9, %s1408_s9 }
 0x951   : > { %v725_v10 = vpop.permute.xlu1 %724 }
 0x952   : > { %1260 = vst.msk [vmem:[%s1133_s29 + $0x18] sm:$0xff] %vm331_vm1, %v725_v10  ;;  %1262 = vmatmul.msk.f32.vlgmr.msrb.gmra.mxu2 %vm331_vm1, %v725_v10 }
 0x9d5   : > { %v756_v12 = vpop.f32.mrf.mxu2 }
 0x9d6   : > { %v757_v13 = vadd.f32 %v756_v12, %v736_v11 }
 0x9d8   : > { %1350 = vtanh.f32 %v757_v13  ;;  %v1263_v15 = vmul.f32 -1.442695, %v757_v13 }
 0x9da   : > { %1352 = vpow2.f32 %v1263_v15 }
 0x9de   : > { %v1351_v14 = vpop.eup %1350 }
 0x9df   : > { %781 = vrot.lane.b32.xlu2 %v1351_v14, %s1407_s8 }
 0x9e0   : > { %v1353_v16 = vpop.eup %1352 }
 0x9e1   : > { %v762_v17 = vadd.f32 1.0, %v1353_v16 }
 0x9e3   : > { %1354 = vrcp.f32 %v762_v17  ;;  %v774_v23 = vand.u32 2147483648, %v762_v17  ;;  %vm768_vm4 = vweird.f32 %v762_v17  ;;  %v772_v24 = vand.u32 2147483647, %v762_v17 }
 0x9e5   : > { %v775_v26 = vor.u32 1.1754944e-38, %v774_v23  ;;  %vm773_vm6 = vcmp.eq.f32.partialorder %v772_v24, 8.507059e+37 }
 0x9e9   : > { %v1355_v18 = vpop.eup %1354 }
 0x9ea   : > { %v764_v19 = vmul.f32 %v1355_v18, %v762_v17  ;;  %vm769_vm3 = vweird.f32 %v1355_v18 }
 0x9eb   : > { %vm770_vm5 = vmor %vm768_vm4, %vm769_vm3 }
 0x9ec   : > { %v765_v20 = vsub.f32 1.0, %v764_v19 }
 0x9ee   : > { %v766_v21 = vmul.f32 %v1355_v18, %v765_v20 }
 0x9f0   : > { %v767_v22 = vadd.f32 %v1355_v18, %v766_v21 }
 0x9f2   : > { %v771_v25 = vsel %vm770_vm5, %v1355_v18, %v767_v22 }
 0x9f3   : > { %v776_v28 = vsel %vm773_vm6, %v775_v26, %v771_v25  ;;  %v1277_v25 = vld [vmem:[%s1157_s22 + $0x38] sm:$0xff] }
 0x9f4   : > { %v779_v30 = vmul.f32 %v776_v28, %v716_v6 }
 0xa39   : > { %v782_v27 = vpop.permute.xlu2 %781 }
 0xa3a   : > { %v784_v29 = vmul.f32 %v782_v27, %v776_v28 }
 0xa3c   : > { %786 = vrot.lane.b32.xlu0 %v784_v29, %s1407_s8 }
 0xaae   : > { %v787_v31 = vpop.permute.xlu0 %786 }
 0xaaf   : > { %v789_v32 = vadd.f32 %v787_v31, %v779_v30 }
 0xab1   : > { %1356 = vtanh.f32 %v789_v32 }
 0xab7   : > { %v1357_v33 = vpop.eup %1356 }
 0xab8   : > { %792 = vrot.lane.b32.xlu1 %v1357_v33, %s1407_s8 }
 0xb2a   : > { %v793_v34 = vpop.permute.xlu1 %792 }
 0xb2b   : > { %v795_v35 = vmul.f32 %v793_v34, %v776_v28 }
 0xb2d   : > { %797 = vrot.lane.b32.xlu2 %v795_v35, %s1408_s9 }
 0xb87   : > { %v798_v36 = vpop.permute.xlu2 %797 }
 0xb88   : > { %801 = vst.msk [vmem:[%s800_s25] sm:$0xff] %vm331_vm1, %v798_v36  ;;  %1266 = vmatmul.msk.f32.vlgmr.msra.gmra.mxu3 %vm331_vm1, %v798_v36 }
 0xc0b   : > { %v830_v38 = vpop.f32.mrf.mxu3 }
 0xc0c   : > { %v831_v39 = vadd.f32 %v1265_v37, %v830_v38 }
 0xc0e   : > { %1358 = vtanh.f32 %v831_v39  ;;  %v1267_v41 = vmul.f32 -1.442695, %v831_v39 }
 0xc10   : > { %1360 = vpow2.f32 %v1267_v41 }
 0xc14   : > { %v1359_v40 = vpop.eup %1358 }
 0xc15   : > { %855 = vrot.lane.b32.xlu0 %v1359_v40, %s1407_s8 }
 0xc16   : > { %v1361_v42 = vpop.eup %1360 }
 0xc17   : > { %v836_v43 = vadd.f32 1.0, %v1361_v42 }
 0xc19   : > { %1362 = vrcp.f32 %v836_v43  ;;  %v848_v49 = vand.u32 2147483648, %v836_v43  ;;  %vm842_vm8 = vweird.f32 %v836_v43  ;;  %v846_v50 = vand.u32 2147483647, %v836_v43 }
 0xc1b   : > { %v849_v52 = vor.u32 1.1754944e-38, %v848_v49  ;;  %vm847_vm10 = vcmp.eq.f32.partialorder %v846_v50, 8.507059e+37 }
 0xc1f   : > { %v1363_v44 = vpop.eup %1362 }
 0xc20   : > { %v838_v45 = vmul.f32 %v1363_v44, %v836_v43  ;;  %vm843_vm7 = vweird.f32 %v1363_v44 }
 0xc21   : > { %vm844_vm9 = vmor %vm842_vm8, %vm843_vm7 }
 0xc22   : > { %v839_v46 = vsub.f32 1.0, %v838_v45 }
 0xc24   : > { %v840_v47 = vmul.f32 %v1363_v44, %v839_v46 }
 0xc26   : > { %v841_v48 = vadd.f32 %v1363_v44, %v840_v47 }
 0xc28   : > { %v845_v51 = vsel %vm844_vm9, %v1363_v44, %v841_v48 }
 0xc29   : > { %v850_v54 = vsel %vm847_vm10, %v849_v52, %v845_v51 }
 0xc2a   : > { %v853_v56 = vmul.f32 %v850_v54, %v789_v32 }
 0xc87   : > { %v856_v53 = vpop.permute.xlu0 %855 }
 0xc88   : > { %v858_v55 = vmul.f32 %v856_v53, %v850_v54 }
 0xc8a   : > { %860 = vrot.lane.b32.xlu1 %v858_v55, %s1407_s8 }
 0xcfc   : > { %v861_v57 = vpop.permute.xlu1 %860 }
 0xcfd   : > { %v863_v58 = vadd.f32 %v861_v57, %v853_v56 }
 0xcff   : > { %1364 = vtanh.f32 %v863_v58 }
 0xd05   : > { %v1365_v59 = vpop.eup %1364 }
 0xd06   : > { %866 = vrot.lane.b32.xlu2 %v1365_v59, %s1407_s8 }
 0xd60   : > { %v867_v60 = vpop.permute.xlu2 %866 }
 0xd61   : > { %v869_v61 = vmul.f32 %v867_v60, %v850_v54 }
 0xd63   : > { %871 = vrot.lane.b32.xlu0 %v869_v61, %s1408_s9 }
 0xdd5   : > { %v872_v62 = vpop.permute.xlu0 %871 }
 0xdd6   : > { %1269 = vst.msk [vmem:[%s1145_s12 + $0x28] sm:$0xff] %vm331_vm1, %v872_v62  ;;  %1272 = vmatmul.msk.f32.vlgmr.msra.gmra.mxu1 %vm331_vm1, %v872_v62 }
 0xe53   : > { %v904_v0 = vpop.f32.mrf.mxu1 }
 0xe54   : > { %v905_v1 = vadd.f32 %v1271_v63, %v904_v0 }
 0xe56   : > { %1366 = vtanh.f32 %v905_v1  ;;  %v1273_v3 = vmul.f32 -1.442695, %v905_v1 }
 0xe58   : > { %1368 = vpow2.f32 %v1273_v3 }
 0xe5c   : > { %v1367_v2 = vpop.eup %1366 }
 0xe5d   : > { %929 = vrot.lane.b32.xlu1 %v1367_v2, %s1407_s8 }
 0xe5e   : > { %v1369_v4 = vpop.eup %1368 }
 0xe5f   : > { %v910_v5 = vadd.f32 1.0, %v1369_v4 }
 0xe61   : > { %1370 = vrcp.f32 %v910_v5  ;;  %v922_v11 = vand.u32 2147483648, %v910_v5  ;;  %vm916_vm12 = vweird.f32 %v910_v5  ;;  %v920_v12 = vand.u32 2147483647, %v910_v5 }
 0xe63   : > { %v923_v14 = vor.u32 1.1754944e-38, %v922_v11  ;;  %vm921_vm14 = vcmp.eq.f32.partialorder %v920_v12, 8.507059e+37 }
 0xe67   : > { %v1371_v6 = vpop.eup %1370 }
 0xe68   : > { %v912_v7 = vmul.f32 %v1371_v6, %v910_v5  ;;  %vm917_vm11 = vweird.f32 %v1371_v6 }
 0xe69   : > { %vm918_vm13 = vmor %vm916_vm12, %vm917_vm11 }
 0xe6a   : > { %v913_v8 = vsub.f32 1.0, %v912_v7 }
 0xe6c   : > { %v914_v9 = vmul.f32 %v1371_v6, %v913_v8 }
 0xe6e   : > { %v915_v10 = vadd.f32 %v1371_v6, %v914_v9 }
 0xe70   : > { %v919_v13 = vsel %vm918_vm13, %v1371_v6, %v915_v10 }
 0xe71   : > { %v924_v16 = vsel %vm921_vm14, %v923_v14, %v919_v13 }
 0xe72   : > { %v927_v18 = vmul.f32 %v924_v16, %v863_v58 }
 0xecf   : > { %v930_v15 = vpop.permute.xlu1 %929 }
 0xed0   : > { %v932_v17 = vmul.f32 %v930_v15, %v924_v16 }
 0xed2   : > { %934 = vrot.lane.b32.xlu2 %v932_v17, %s1407_s8 }
 0xf2c   : > { %v935_v19 = vpop.permute.xlu2 %934 }
 0xf2d   : > { %v937_v20 = vadd.f32 %v935_v19, %v927_v18 }
 0xf2f   : > { %1372 = vtanh.f32 %v937_v20 }
 0xf35   : > { %v1373_v21 = vpop.eup %1372 }
 0xf36   : > { %940 = vrot.lane.b32.xlu0 %v1373_v21, %s1407_s8 }
 0xfa8   : > { %v941_v22 = vpop.permute.xlu0 %940 }
 0xfa9   : > { %v943_v23 = vmul.f32 %v941_v22, %v924_v16 }
 0xfab   : > { %945 = vrot.lane.b32.xlu1 %v943_v23, %s1408_s9 }
0x101d   : > { %v946_v24 = vpop.permute.xlu1 %945 }
0x101e   : > { %1275 = vst.msk [vmem:[%s1153_s19 + $0x30] sm:$0xff] %vm331_vm1, %v946_v24  ;;  %1278 = vmatmul.msk.f32.vlgmr.msra.gmra.mxu2 %vm331_vm1, %v946_v24 }
0x10a1   : > { %v978_v26 = vpop.f32.mrf.mxu2 }
0x10a2   : > { %v979_v27 = vadd.f32 %v1277_v25, %v978_v26 }
0x10a4   : > { %1374 = vtanh.f32 %v979_v27  ;;  %v1279_v29 = vmul.f32 -1.442695, %v979_v27 }
0x10a6   : > { %1376 = vpow2.f32 %v1279_v29 }
0x10aa   : > { %v1375_v28 = vpop.eup %1374 }
0x10ab   : > { %1003 = vrot.lane.b32.xlu2 %v1375_v28, %s1407_s8 }
0x10ac   : > { %v1377_v30 = vpop.eup %1376 }
0x10ad   : > { %v984_v31 = vadd.f32 1.0, %v1377_v30 }
0x10af   : > { %1378 = vrcp.f32 %v984_v31  ;;  %v996_v37 = vand.u32 2147483648, %v984_v31  ;;  %vm990_vm0 = vweird.f32 %v984_v31  ;;  %v994_v38 = vand.u32 2147483647, %v984_v31 }
0x10b1   : > { %v997_v40 = vor.u32 1.1754944e-38, %v996_v37  ;;  %vm995_vm3 = vcmp.eq.f32.partialorder %v994_v38, 8.507059e+37 }
0x10b5   : > { %v1379_v32 = vpop.eup %1378 }
0x10b6   : > { %v986_v33 = vmul.f32 %v1379_v32, %v984_v31  ;;  %vm991_vm15 = vweird.f32 %v1379_v32 }
0x10b7   : > { %vm992_vm2 = vmor %vm990_vm0, %vm991_vm15 }
0x10b8   : > { %v987_v34 = vsub.f32 1.0, %v986_v33 }
0x10ba   : > { %v988_v35 = vmul.f32 %v1379_v32, %v987_v34 }
0x10bc   : > { %v989_v36 = vadd.f32 %v1379_v32, %v988_v35 }
0x10be   : > { %v993_v39 = vsel %vm992_vm2, %v1379_v32, %v989_v36 }
0x10bf   : > { %v998_v42 = vsel %vm995_vm3, %v997_v40, %v993_v39 }
0x10c0   : > { %v1001_v44 = vmul.f32 %v998_v42, %v937_v20 }
0x1105   : > { %v1004_v41 = vpop.permute.xlu2 %1003 }
0x1106   : > { %v1006_v43 = vmul.f32 %v1004_v41, %v998_v42 }
0x1108   : > { %1008 = vrot.lane.b32.xlu0 %v1006_v43, %s1407_s8 }
0x117a   : > { %v1009_v45 = vpop.permute.xlu0 %1008 }
0x117b   : > { %v1011_v46 = vadd.f32 %v1009_v45, %v1001_v44 }
0x117d   : > { %1380 = vtanh.f32 %v1011_v46  ;;  %1026 = vrot.lane.b32.xlu0 %v1011_v46, %s1409_s23 }
0x1183   : > { %v1381_v47 = vpop.eup %1380 }
0x1184   : > { %1014 = vrot.lane.b32.xlu1 %v1381_v47, %s1407_s8 }
0x11ef   : > { %v1027_v48 = vpop.permute.xlu0 %1026 }
0x11f0   : > { %1029 = vst.msk [vmem:[%s1550_s30] sm:$0xff] %vm331_vm1, %v1027_v48 }
0x11f6   : > { %v1015_v49 = vpop.permute.xlu1 %1014 }
0x11f7   : > { %v1017_v50 = vmul.f32 %v1015_v49, %v998_v42 }
0x11f9   : > { %1019 = vrot.lane.b32.xlu2 %v1017_v50, %s1408_s9 }
0x1253   : > { %v1020_v51 = vpop.permute.xlu2 %1019 }
0x1254   : > { %1281 = vst.msk [vmem:[%s1161_s24 + $0x38] sm:$0xff] %vm331_vm1, %v1020_v51 }
0x1255   : > { %1024 = vst.msk [vmem:[%s1488_s10] sm:$0xff] %vm331_vm1, %v1020_v51 }
0x1256 PF: > { %s14_s17 = sadd.s32 1, %s1404_s17   ;;  %s1681_s15 = smov %s1400_s16 }
0x1257   : > { %p11_p5 = scmp.ge.s32.totalorder %s14_s17, 4   ;;  %s1682_s16 = smov %s1684_s18 }
0x1259   :  { %13 = sbr.rel (!%p11_p5) target bundleno = 2 (0x2), region = 99 }

</bundles_post_ra>
